<compile_context>
chip_gen: v7x
topology: tpu7x:2x2x1
jax: 0.10.0
libtpu: 0.0.40
codegen_flags: <defaults>
</compile_context>

<pallas_src>
import math
import functools

import jax
import jax.numpy as jnp
from jax import lax
from jax.experimental import pallas as pl
from jax.experimental.pallas import tpu as pltpu


# ------------------------- per-generation limits & tiling -------------------------

TM_CAP = 512
TN_CAP = 1024
TK_CAP = 1024


def _derive_vmem_limit():
    # ~3/4 of physical VMEM: ~48 MiB on v7x (64 MiB), ~96-100 MiB on v5e/v6e (128 MiB).
    try:
        cap = int(pltpu.get_tpu_info().vmem_capacity_bytes)
    except Exception:
        cap = 64 * 1024 * 1024
    return min((cap * 3) // 4, 100 * 1024 * 1024)


VMEM_LIMIT = _derive_vmem_limit()


def _round_up(x, m):
    return ((x + m - 1) // m) * m


def _pick_tile(dim, cap, align):
    """Largest tile <= cap that evenly divides dim (dim is pre-padded to `align`)."""
    if dim <= cap:
        return dim
    t = (cap // align) * align
    while t >= align:
        if dim % t == 0:
            return t
        t -= align
    return dim  # unreachable once dim % align == 0


# ---------------------------- Pallas kernels ----------------------------

def _matmul_kernel(x_ref, w_ref, b_ref, o_ref, acc_ref, *, relu):
    # Tiled y = x @ W + b with f32 accumulation over the K grid axis; optional fused ReLU.
    k = pl.program_id(2)

    @pl.when(k == 0)
    def _():
        acc_ref[...] = jnp.zeros_like(acc_ref)

    acc_ref[...] += jnp.dot(x_ref[...], w_ref[...], preferred_element_type=jnp.float32)

    @pl.when(k == pl.num_programs(2) - 1)
    def _():
        y = acc_ref[...] + b_ref[...]
        if relu:
            y = jnp.maximum(y, 0.0)
        o_ref[...] = y.astype(o_ref.dtype)


def _matmul_res_ln_kernel(x_ref, w_ref, b_ref, r_ref, g_ref, bt_ref, o_ref, acc_ref):
    # Tiled y = LayerNorm(residual + (x @ W + b)) * gamma + beta  (post-norm, eps=1e-5).
    k = pl.program_id(1)

    @pl.when(k == 0)
    def _():
        acc_ref[...] = jnp.zeros_like(acc_ref)

    acc_ref[...] += jnp.dot(x_ref[...], w_ref[...], preferred_element_type=jnp.float32)

    @pl.when(k == pl.num_programs(1) - 1)
    def _():
        y = acc_ref[...] + b_ref[...] + r_ref[...].astype(jnp.float32)
        mu = jnp.mean(y, axis=-1, keepdims=True)
        var = jnp.mean(y * y, axis=-1, keepdims=True) - mu * mu   # one-pass variance
        yn = (y - mu) * lax.rsqrt(var + 1e-5)
        o_ref[...] = (yn * g_ref[...] + bt_ref[...]).astype(o_ref.dtype)


def _attn_kernel(qkv_ref, o_ref, *, n_head, dk, causal):
    # One batch per grid step. qkv_ref: (S, 3*D) bf16, D = n_head*dk, columns = [q | k | v].
    # q already carries the 1/sqrt(dk) scale (folded into in_proj at init).
    # Heads are processed one at a time (ref slices stay lazy, live range = one head) and
    # each head's result is stored straight into its o_ref column slab (no concatenate).
    S = o_ref.shape[0]
    D = n_head * dk

    if causal:
        row = lax.broadcasted_iota(jnp.int32, (S, S), 0)
        col = lax.broadcasted_iota(jnp.int32, (S, S), 1)
        allowed = row >= col

    for h in range(n_head):
        qh = qkv_ref[:, h * dk:(h + 1) * dk]                       # (S, dk) bf16
        kh = qkv_ref[:, D + h * dk:D + (h + 1) * dk]               # (S, dk) bf16
        vh = qkv_ref[:, 2 * D + h * dk:2 * D + (h + 1) * dk]       # (S, dk) bf16

        # q @ k^T on the MXU (contract last dims directly; no explicit transpose).
        s = lax.dot_general(qh, kh, (((1,), (1,)), ((), ())),
                            preferred_element_type=jnp.float32)
        if causal:
            s = jnp.where(allowed, s, -1e30)

        mx = jnp.max(s, axis=-1, keepdims=True)
        p = jnp.exp(s - mx)
        inv = pl.reciprocal(jnp.sum(p, axis=-1, keepdims=True), approx=True)
        p = (p * inv).astype(jnp.bfloat16)

        o_ref[:, h * dk:(h + 1) * dk] = jnp.dot(
            p, vh, preferred_element_type=jnp.float32).astype(o_ref.dtype)


# ---------------------------- kernel wrappers ----------------------------

def linear(x, w, b, relu=False, out_dtype=jnp.bfloat16):
    """Tiled y = x @ w + b; x: (M, K) bf16, w: (K, N) bf16, b: (N,) f32."""
    M, K = x.shape
    N = w.shape[1]
    Mp, Kp, Np = _round_up(M, 8), _round_up(K, 128), _round_up(N, 128)
    if (Mp, Kp) != (M, K):
        x = jnp.pad(x, ((0, Mp - M), (0, Kp - K)))
    if (Kp, Np) != (K, N):
        w = jnp.pad(w, ((0, Kp - K), (0, Np - N)))
    if Np != N:
        b = jnp.pad(b, ((0, Np - N),))

    tm = _pick_tile(Mp, TM_CAP, 8)
    tn = _pick_tile(Np, TN_CAP, 128)
    tk = _pick_tile(Kp, TK_CAP, 128)
    grid = (Mp // tm, Np // tn, Kp // tk)
    out_bytes = Mp * Np * jnp.dtype(out_dtype).itemsize
    cost = pl.CostEstimate(flops=2 * Mp * Np * Kp, transcendentals=0,
                           bytes_accessed=Mp * Kp * 2 + Kp * Np * 2 + out_bytes + Np * 4)

    out = pl.pallas_call(
        functools.partial(_matmul_kernel, relu=relu),
        out_shape=jax.ShapeDtypeStruct((Mp, Np), out_dtype),
        grid=grid,
        in_specs=[pl.BlockSpec((tm, tk), lambda i, j, k: (i, k)),
                  pl.BlockSpec((tk, tn), lambda i, j, k: (k, j)),
                  pl.BlockSpec((1, tn), lambda i, j, k: (0, j))],
        out_specs=pl.BlockSpec((tm, tn), lambda i, j, k: (i, j)),
        scratch_shapes=[pltpu.VMEM((tm, tn), jnp.float32)],
        compiler_params=pltpu.CompilerParams(
            dimension_semantics=("parallel", "parallel", "arbitrary"),
            vmem_limit_bytes=VMEM_LIMIT),
        cost_estimate=cost,
    )(x, w, b.reshape(1, Np))

    if (Mp, Np) != (M, N):
        out = out[:M, :N]
    return out


def linear_res_ln(x, w, b, resid, gamma, beta):
    """Fused y = LayerNorm(resid + x @ w + b); x: (M, K) bf16, w: (K, N) bf16.
    N (= d_model) is never tiled so LayerNorm sees the full feature dim."""
    M, K = x.shape
    N = w.shape[1]
    Mp, Kp = _round_up(M, 8), _round_up(K, 128)
    if (Mp, Kp) != (M, K):
        x = jnp.pad(x, ((0, Mp - M), (0, Kp - K)))
    if Kp != K:
        w = jnp.pad(w, ((0, Kp - K), (0, 0)))
    if Mp != M:
        resid = jnp.pad(resid, ((0, Mp - M), (0, 0)))

    tm = _pick_tile(Mp, TM_CAP, 8)
    tk = _pick_tile(Kp, TK_CAP, 128)
    grid = (Mp // tm, Kp // tk)
    cost = pl.CostEstimate(flops=2 * Mp * N * Kp + 8 * Mp * N, transcendentals=0,
                           bytes_accessed=Mp * Kp * 2 + Kp * N * 2 + 2 * Mp * N * 2 + 3 * N * 4)

    out = pl.pallas_call(
        _matmul_res_ln_kernel,
        out_shape=jax.ShapeDtypeStruct((Mp, N), jnp.bfloat16),
        grid=grid,
        in_specs=[pl.BlockSpec((tm, tk), lambda i, k: (i, k)),
                  pl.BlockSpec((tk, N), lambda i, k: (k, 0)),
                  pl.BlockSpec((1, N), lambda i, k: (0, 0)),
                  pl.BlockSpec((tm, N), lambda i, k: (i, 0)),
                  pl.BlockSpec((1, N), lambda i, k: (0, 0)),
                  pl.BlockSpec((1, N), lambda i, k: (0, 0))],
        out_specs=pl.BlockSpec((tm, N), lambda i, k: (i, 0)),
        scratch_shapes=[pltpu.VMEM((tm, N), jnp.float32)],
        compiler_params=pltpu.CompilerParams(
            dimension_semantics=("parallel", "arbitrary"),
            vmem_limit_bytes=VMEM_LIMIT),
        cost_estimate=cost,
    )(x, w, b.reshape(1, N), resid, gamma.reshape(1, N), beta.reshape(1, N))

    if Mp != M:
        out = out[:M]
    return out


def attention(qkv, *, B, S, n_head, dk, causal):
    """qkv: (B*S, 3*D) bf16 batch-major; returns (B*S, D) bf16 attention output."""
    D = n_head * dk
    return pl.pallas_call(
        functools.partial(_attn_kernel, n_head=n_head, dk=dk, causal=causal),
        out_shape=jax.ShapeDtypeStruct((B * S, D), jnp.bfloat16),
        grid=(B,),
        in_specs=[pl.BlockSpec((S, 3 * D), lambda b: (b, 0))],
        out_specs=pl.BlockSpec((S, D), lambda b: (b, 0)),
        compiler_params=pltpu.CompilerParams(
            dimension_semantics=("parallel",),
            vmem_limit_bytes=VMEM_LIMIT),
    )(qkv)


def linear_logits(x, w, b, *, B, S):
    """Final fc producing logits directly in (S, B, V) layout: grid (B, V-tiles, K-tiles)
    with one batch per M tile; the out_spec places each (S, tn) tile at column block
    b*(V/tn)+j of an (S, B*V) slab, so the trailing transpose disappears."""
    M, K = x.shape
    V = w.shape[1]
    if S % 8 != 0 and B > 1:
        # TODO(synk): ragged S fallback keeps the XLA transpose.
        logits = linear(x, w, b, out_dtype=jnp.float32)
        return logits.reshape(B, S, V).transpose(1, 0, 2)

    Kp, Vp = _round_up(K, 128), _round_up(V, 128)
    if Kp != K:
        x = jnp.pad(x, ((0, 0), (0, Kp - K)))
        w = jnp.pad(w, ((0, Kp - K), (0, 0)))
    if Vp != V:
        w = jnp.pad(w, ((0, 0), (0, Vp - V)))
        b = jnp.pad(b, ((0, Vp - V),))

    tn = _pick_tile(Vp, TN_CAP, 128)
    tk = _pick_tile(Kp, TK_CAP, 128)
    nj = Vp // tn
    grid = (B, nj, Kp // tk)
    cost = pl.CostEstimate(flops=2 * M * Vp * Kp, transcendentals=0,
                           bytes_accessed=M * Kp * 2 + Kp * Vp * 2 + M * Vp * 4 + Vp * 4)

    out = pl.pallas_call(
        functools.partial(_matmul_kernel, relu=False),
        out_shape=jax.ShapeDtypeStruct((S, B * Vp), jnp.float32),
        grid=grid,
        in_specs=[pl.BlockSpec((S, tk), lambda bi, j, k: (bi, k)),
                  pl.BlockSpec((tk, tn), lambda bi, j, k: (k, j)),
                  pl.BlockSpec((1, tn), lambda bi, j, k: (0, j))],
        out_specs=pl.BlockSpec((S, tn), lambda bi, j, k: (0, bi * nj + j)),
        scratch_shapes=[pltpu.VMEM((S, tn), jnp.float32)],
        compiler_params=pltpu.CompilerParams(
            dimension_semantics=("parallel", "parallel", "arbitrary"),
            vmem_limit_bytes=VMEM_LIMIT),
        cost_estimate=cost,
    )(x, w, b.reshape(1, Vp))

    logits = out.reshape(S, B, Vp)
    if Vp != V:
        logits = logits[:, :, :V]
    return logits


# ---------------------------- model forward ----------------------------

def transformer_forward(tokens, params, *, n_head, use_mask=True):
    S, B = tokens.shape                      # seq-first input (PyTorch batch_first=False)
    D = params["pe"].shape[1]
    dk = D // n_head

    # Embedding gather + PE add stay in XLA glue (single fused pass); sqrt(n_vocab) is
    # pre-folded into the embedding table. Activations flow batch-major bf16 (B*S, D).
    emb = params["embedding"][tokens.T]                               # (B, S, D) f32
    x = (emb + params["pe"][:S][None, :, :]).reshape(B * S, D).astype(jnp.bfloat16)

    for lp in params["layers"]:
        # ---- self-attention block ----
        qkv = linear(x, lp["in_proj_w"], lp["in_proj_b"])             # (B*S, 3D) bf16
        ao = attention(qkv, B=B, S=S, n_head=n_head, dk=dk, causal=use_mask)
        x = linear_res_ln(ao, lp["out_proj_w"], lp["out_proj_b"],
                          x, lp["ln1_g"], lp["ln1_b"])                # out_proj + add&norm

        # ---- feed-forward block (ReLU; dropout = identity at inference) ----
        h = linear(x, lp["w1"], lp["b1"], relu=True)                  # bf16 hidden
        x = linear_res_ln(h, lp["w2"], lp["b2"], x, lp["ln2_g"], lp["ln2_b"])

    return linear_logits(x, params["fc_w"], params["fc_b"], B=B, S=S)  # (S, B, V) f32


# ---------------------------- deterministic init ----------------------------

def init_params(key, n_vocab, d_model, n_head, n_layers, dim_ff, max_len=5000):
    assert d_model % n_head == 0
    dk = d_model // n_head
    keys = iter(jax.random.split(key, 2 + 8 * n_layers))

    def uni(k, shape, a):
        return jax.random.uniform(k, shape, jnp.float32, minval=-a, maxval=a)

    params = {
        # sqrt(n_vocab) embedding scale folded into the table (zero runtime cost).
        "embedding": uni(next(keys), (n_vocab, d_model), 0.1) * math.sqrt(float(n_vocab)),
        "fc_w": uni(next(keys), (d_model, n_vocab), 0.1).astype(jnp.bfloat16),
        "fc_b": jnp.zeros((n_vocab,), jnp.float32),
    }

    layers = []
    s_in = 1.0 / math.sqrt(d_model)
    s_ff = 1.0 / math.sqrt(dim_ff)
    q_scale = 1.0 / math.sqrt(dk)
    for _ in range(n_layers):
        in_w = uni(next(keys), (d_model, 3 * d_model), s_in)
        in_b = uni(next(keys), (3 * d_model,), s_in)
        # Fold 1/sqrt(dk) attention score scale into the q columns of in_proj.
        in_w = in_w.at[:, :d_model].multiply(q_scale)
        in_b = in_b.at[:d_model].multiply(q_scale)
        layers.append({
            "in_proj_w": in_w.astype(jnp.bfloat16),
            "in_proj_b": in_b,
            "out_proj_w": uni(next(keys), (d_model, d_model), s_in).astype(jnp.bfloat16),
            "out_proj_b": uni(next(keys), (d_model,), s_in),
            "w1": uni(next(keys), (d_model, dim_ff), s_in).astype(jnp.bfloat16),
            "b1": uni(next(keys), (dim_ff,), s_in),
            "w2": uni(next(keys), (dim_ff, d_model), s_ff).astype(jnp.bfloat16),
            "b2": uni(next(keys), (d_model,), s_ff),
            "ln1_g": jnp.ones((d_model,), jnp.float32),
            "ln1_b": jnp.zeros((d_model,), jnp.float32),
            "ln2_g": jnp.ones((d_model,), jnp.float32),
            "ln2_b": jnp.zeros((d_model,), jnp.float32),
        })
    params["layers"] = layers

    # PositionalEncoding buffer (f32)
    position = jnp.arange(max_len, dtype=jnp.float32)[:, None]
    div_term = jnp.exp(jnp.arange(0, d_model, 2, dtype=jnp.float32)
                       * (-math.log(10000.0) / d_model))
    pe = jnp.zeros((max_len, d_model), jnp.float32)
    pe = pe.at[:, 0::2].set(jnp.sin(position * div_term))
    pe = pe.at[:, 1::2].set(jnp.cos(position * div_term))
    params["pe"] = pe
    return params


# ---------------------------- main ----------------------------

if __name__ == "__main__":
    # Small synthetic configuration consistent with the module's forward
    # (d_model=512, n_head=8, n_layers=10, ff=2048 scaled down).
    S, B = 8, 2
    n_vocab, d_model, n_head, n_layers, dim_ff = 256, 128, 4, 2, 256

    key = jax.random.PRNGKey(0)
    k_params, k_tokens = jax.random.split(key)
    params = init_params(k_params, n_vocab, d_model, n_head, n_layers, dim_ff)
    tokens = jax.random.randint(k_tokens, (S, B), 0, n_vocab, dtype=jnp.int32)

    fwd = jax.jit(functools.partial(transformer_forward, n_head=n_head, use_mask=True))
    logits = fwd(tokens, params)
    logits = jax.block_until_ready(logits)

    assert logits.shape == (S, B, n_vocab), logits.shape
    assert bool(jnp.all(jnp.isfinite(logits)))
    print("KERNEL_OK")
</pallas_src>

<mosaic_0001>
module attributes {stable_mosaic.version = 11 : i64} {
  func.func @_matmul_kernel(%arg0: i32, %arg1: i32, %arg2: i32, %arg3: memref<16x128xbf16, #tpu.memory_space<vmem>>, %arg4: memref<128x384xbf16, #tpu.memory_space<vmem>>, %arg5: memref<1x384xf32, #tpu.memory_space<vmem>>, %arg6: memref<16x384xbf16, #tpu.memory_space<vmem>>, %arg7: memref<16x384xf32, #tpu.memory_space<vmem>>) attributes {dimension_semantics = [#tpu.dimension_semantics<parallel>, #tpu.dimension_semantics<parallel>, #tpu.dimension_semantics<arbitrary>], iteration_bounds = array<i64: 1, 1, 1>, scalar_prefetch = 0 : i64, scratch_operands = 1 : i64, tpu.core_type = #tpu.core_type<tc>, window_params = [{transform_indices = @transform_0, window_bounds = array<i64: 16, 128>}, {transform_indices = @transform_1, window_bounds = array<i64: 128, 384>}, {transform_indices = @transform_2, window_bounds = array<i64: 1, 384>}, {transform_indices = @transform_3, window_bounds = array<i64: 16, 384>}]} {
    %c0_i32 = arith.constant 0 : i32
    %0 = arith.cmpi eq, %arg2, %c0_i32 : i32
    %1 = arith.extui %0 : i1 to i32
    %c0_i32_0 = arith.constant 0 : i32
    %2 = arith.cmpi ne, %1, %c0_i32_0 : i32
    scf.if %2 {
      %cst_10 = arith.constant 0.000000e+00 : f32
      %12 = vector.broadcast %cst_10 : f32 to vector<16x384xf32>
      %c0_11 = arith.constant 0 : index
      %c0_12 = arith.constant 0 : index
      %13 = vector.load %arg7[%c0_11, %c0_12] : memref<16x384xf32, #tpu.memory_space<vmem>>, vector<16x384xf32>
      tpu.vector_store %arg7[%c0_11, %c0_12], %12 {strides = array<i32>} : memref<16x384xf32, #tpu.memory_space<vmem>>, vector<16x384xf32>,
    } else {
    }
    %c0 = arith.constant 0 : index
    %c0_1 = arith.constant 0 : index
    %3 = vector.load %arg7[%c0, %c0_1] : memref<16x384xf32, #tpu.memory_space<vmem>>, vector<16x384xf32>
    %c0_2 = arith.constant 0 : index
    %c0_3 = arith.constant 0 : index
    %4 = vector.load %arg3[%c0_2, %c0_3] : memref<16x128xbf16, #tpu.memory_space<vmem>>, vector<16x128xbf16>
    %c0_4 = arith.constant 0 : index
    %c0_5 = arith.constant 0 : index
    %5 = vector.load %arg4[%c0_4, %c0_5] : memref<128x384xbf16, #tpu.memory_space<vmem>>, vector<128x384xbf16>
    %cst = arith.constant dense<0.000000e+00> : vector<16x384xf32>
    %6 = tpu.matmul %4, %5, %cst {dimension_numbers = #tpu.dot_dimension_numbers<[1], [0], [0], [1], [0, 0, 1, 1], [], []>} : vector<16x128xbf16>, vector<128x384xbf16>, vector<16x384xf32> -> vector<16x384xf32>
    %7 = arith.addf %3, %6 : vector<16x384xf32>
    %c0_6 = arith.constant 0 : index
    %c0_7 = arith.constant 0 : index
    %8 = vector.load %arg7[%c0_6, %c0_7] : memref<16x384xf32, #tpu.memory_space<vmem>>, vector<16x384xf32>
    tpu.vector_store %arg7[%c0_6, %c0_7], %7 {strides = array<i32>} : memref<16x384xf32, #tpu.memory_space<vmem>>, vector<16x384xf32>,
    %c0_i32_8 = arith.constant 0 : i32
    %9 = arith.cmpi eq, %arg2, %c0_i32_8 : i32
    %10 = arith.extui %9 : i1 to i32
    %c0_i32_9 = arith.constant 0 : i32
    %11 = arith.cmpi ne, %10, %c0_i32_9 : i32
    scf.if %11 {
      %c0_10 = arith.constant 0 : index
      %c0_11 = arith.constant 0 : index
      %12 = vector.load %arg7[%c0_10, %c0_11] : memref<16x384xf32, #tpu.memory_space<vmem>>, vector<16x384xf32>
      %c0_12 = arith.constant 0 : index
      %c0_13 = arith.constant 0 : index
      %13 = vector.load %arg5[%c0_12, %c0_13] : memref<1x384xf32, #tpu.memory_space<vmem>>, vector<1x384xf32>
      %14 = vector.broadcast %13 : vector<1x384xf32> to vector<16x384xf32>
      %15 = arith.addf %12, %14 : vector<16x384xf32>
      %16 = arith.truncf %15 : vector<16x384xf32> to vector<16x384xbf16>
      %c0_14 = arith.constant 0 : index
      %c0_15 = arith.constant 0 : index
      %17 = vector.load %arg6[%c0_14, %c0_15] : memref<16x384xbf16, #tpu.memory_space<vmem>>, vector<16x384xbf16>
      tpu.vector_store %arg6[%c0_14, %c0_15], %16 {strides = array<i32>} : memref<16x384xbf16, #tpu.memory_space<vmem>>, vector<16x384xbf16>,
    } else {
    }
    return
  }
  func.func @transform_0(%arg0: i32, %arg1: i32, %arg2: i32) -> (i32, i32) {
    %c0_i32 = arith.constant 0 : i32
    return %arg0, %arg2 : i32, i32
  }
  func.func @transform_1(%arg0: i32, %arg1: i32, %arg2: i32) -> (i32, i32) {
    %c0_i32 = arith.constant 0 : i32
    return %arg2, %arg1 : i32, i32
  }
  func.func @transform_2(%arg0: i32, %arg1: i32, %arg2: i32) -> (i32, i32) {
    %c0_i32 = arith.constant 0 : i32
    %c0_i32_0 = arith.constant 0 : i32
    return %c0_i32, %arg1 : i32, i32
  }
  func.func @transform_3(%arg0: i32, %arg1: i32, %arg2: i32) -> (i32, i32) {
    %c0_i32 = arith.constant 0 : i32
    return %arg0, %arg1 : i32, i32
  }
}

module attributes {stable_mosaic.version = 11 : i64} {
  func.func @_attn_kernel(%arg0: i32, %arg1: memref<8x384xbf16, #tpu.memory_space<vmem>>, %arg2: memref<8x128xbf16, #tpu.memory_space<vmem>>) attributes {dimension_semantics = [#tpu.dimension_semantics<parallel>], iteration_bounds = array<i64: 2>, scalar_prefetch = 0 : i64, scratch_operands = 0 : i64, tpu.core_type = #tpu.core_type<tc>, window_params = [{transform_indices = @transform_0, window_bounds = array<i64: 8, 384>}, {transform_indices = @transform_1, window_bounds = array<i64: 8, 128>}]} {
    %0 = tpu.iota {dimensions = array<i32: 0>} : vector<8x8xi32>
    %1 = tpu.iota {dimensions = array<i32: 1>} : vector<8x8xi32>
    %2 = arith.cmpi sge, %0, %1 : vector<8x8xi32>
    %c0 = arith.constant 0 : index
    %c0_0 = arith.constant 0 : index
    %3 = vector.load %arg1[%c0, %c0_0] : memref<8x384xbf16, #tpu.memory_space<vmem>>, vector<8x32xbf16>
    %c0_1 = arith.constant 0 : index
    %c128 = arith.constant 128 : index
    %4 = vector.load %arg1[%c0_1, %c128] : memref<8x384xbf16, #tpu.memory_space<vmem>>, vector<8x32xbf16>
    %c0_2 = arith.constant 0 : index
    %c256 = arith.constant 256 : index
    %5 = vector.load %arg1[%c0_2, %c256] : memref<8x384xbf16, #tpu.memory_space<vmem>>, vector<8x32xbf16>
    %cst = arith.constant dense<0.000000e+00> : vector<8x8xf32>
    %6 = tpu.matmul %3, %4, %cst {dimension_numbers = #tpu.dot_dimension_numbers<[1], [1], [0], [0], [0, 0, 1, 0], [], []>} : vector<8x32xbf16>, vector<8x32xbf16>, vector<8x8xf32> -> vector<8x8xf32>
    %cst_3 = arith.constant -1.000000e+30 : f32
    %7 = vector.broadcast %cst_3 : f32 to vector<8x8xf32>
    %8 = arith.select %2, %6, %7 : vector<8x8xi1>, vector<8x8xf32>
    %cst_4 = arith.constant dense<0xFF800000> : vector<8xf32>
    %9 = vector.multi_reduction <maximumf>, %8, %cst_4 [1] : vector<8x8xf32> to vector<8xf32>
    %10 = vector.shape_cast %9 : vector<8xf32> to vector<8x1xf32>
    %11 = vector.broadcast %10 : vector<8x1xf32> to vector<8x8xf32>
    %12 = arith.subf %8, %11 : vector<8x8xf32>
    %13 = math.exp %12 : vector<8x8xf32>
    %cst_5 = arith.constant dense<0.000000e+00> : vector<8xf32>
    %14 = vector.multi_reduction <add>, %13, %cst_5 [1] : vector<8x8xf32> to vector<8xf32>
    %15 = vector.shape_cast %14 : vector<8xf32> to vector<8x1xf32>
    %16 = tpu.reciprocal %15 {approx = true} : vector<8x1xf32> -> vector<8x1xf32>
    %17 = vector.broadcast %16 : vector<8x1xf32> to vector<8x8xf32>
    %18 = arith.mulf %13, %17 : vector<8x8xf32>
    %19 = arith.truncf %18 : vector<8x8xf32> to vector<8x8xbf16>
    %cst_6 = arith.constant dense<0.000000e+00> : vector<8x32xf32>
    %20 = tpu.matmul %19, %5, %cst_6 {dimension_numbers = #tpu.dot_dimension_numbers<[1], [0], [0], [1], [0, 0, 1, 1], [], []>} : vector<8x8xbf16>, vector<8x32xbf16>, vector<8x32xf32> -> vector<8x32xf32>
    %21 = arith.truncf %20 : vector<8x32xf32> to vector<8x32xbf16>
    %c0_7 = arith.constant 0 : index
    %c0_8 = arith.constant 0 : index
    %22 = vector.load %arg2[%c0_7, %c0_8] : memref<8x128xbf16, #tpu.memory_space<vmem>>, vector<8x32xbf16>
    tpu.vector_store %arg2[%c0_7, %c0_8], %21 {strides = array<i32>} : memref<8x128xbf16, #tpu.memory_space<vmem>>, vector<8x32xbf16>,
    %c0_9 = arith.constant 0 : index
    %c32 = arith.constant 32 : index
    %23 = vector.load %arg1[%c0_9, %c32] : memref<8x384xbf16, #tpu.memory_space<vmem>>, vector<8x32xbf16>
    %c0_10 = arith.constant 0 : index
    %c160 = arith.constant 160 : index
    %24 = vector.load %arg1[%c0_10, %c160] : memref<8x384xbf16, #tpu.memory_space<vmem>>, vector<8x32xbf16>
    %c0_11 = arith.constant 0 : index
    %c288 = arith.constant 288 : index
    %25 = vector.load %arg1[%c0_11, %c288] : memref<8x384xbf16, #tpu.memory_space<vmem>>, vector<8x32xbf16>
    %cst_12 = arith.constant dense<0.000000e+00> : vector<8x8xf32>
    %26 = tpu.matmul %23, %24, %cst_12 {dimension_numbers = #tpu.dot_dimension_numbers<[1], [1], [0], [0], [0, 0, 1, 0], [], []>} : vector<8x32xbf16>, vector<8x32xbf16>, vector<8x8xf32> -> vector<8x8xf32>
    %cst_13 = arith.constant -1.000000e+30 : f32
    %27 = vector.broadcast %cst_13 : f32 to vector<8x8xf32>
    %28 = arith.select %2, %26, %27 : vector<8x8xi1>, vector<8x8xf32>
    %cst_14 = arith.constant dense<0xFF800000> : vector<8xf32>
    %29 = vector.multi_reduction <maximumf>, %28, %cst_14 [1] : vector<8x8xf32> to vector<8xf32>
    %30 = vector.shape_cast %29 : vector<8xf32> to vector<8x1xf32>
    %31 = vector.broadcast %30 : vector<8x1xf32> to vector<8x8xf32>
    %32 = arith.subf %28, %31 : vector<8x8xf32>
    %33 = math.exp %32 : vector<8x8xf32>
    %cst_15 = arith.constant dense<0.000000e+00> : vector<8xf32>
    %34 = vector.multi_reduction <add>, %33, %cst_15 [1] : vector<8x8xf32> to vector<8xf32>
    %35 = vector.shape_cast %34 : vector<8xf32> to vector<8x1xf32>
    %36 = tpu.reciprocal %35 {approx = true} : vector<8x1xf32> -> vector<8x1xf32>
    %37 = vector.broadcast %36 : vector<8x1xf32> to vector<8x8xf32>
    %38 = arith.mulf %33, %37 : vector<8x8xf32>
    %39 = arith.truncf %38 : vector<8x8xf32> to vector<8x8xbf16>
    %cst_16 = arith.constant dense<0.000000e+00> : vector<8x32xf32>
    %40 = tpu.matmul %39, %25, %cst_16 {dimension_numbers = #tpu.dot_dimension_numbers<[1], [0], [0], [1], [0, 0, 1, 1], [], []>} : vector<8x8xbf16>, vector<8x32xbf16>, vector<8x32xf32> -> vector<8x32xf32>
    %41 = arith.truncf %40 : vector<8x32xf32> to vector<8x32xbf16>
    %c0_17 = arith.constant 0 : index
    %c32_18 = arith.constant 32 : index
    %42 = vector.load %arg2[%c0_17, %c32_18] : memref<8x128xbf16, #tpu.memory_space<vmem>>, vector<8x32xbf16>
    tpu.vector_store %arg2[%c0_17, %c32_18], %41 {strides = array<i32>} : memref<8x128xbf16, #tpu.memory_space<vmem>>, vector<8x32xbf16>,
    %c0_19 = arith.constant 0 : index
    %c64 = arith.constant 64 : index
    %43 = vector.load %arg1[%c0_19, %c64] : memref<8x384xbf16, #tpu.memory_space<vmem>>, vector<8x32xbf16>
    %c0_20 = arith.constant 0 : index
    %c192 = arith.constant 192 : index
    %44 = vector.load %arg1[%c0_20, %c192] : memref<8x384xbf16, #tpu.memory_space<vmem>>, vector<8x32xbf16>
    %c0_21 = arith.constant 0 : index
    %c320 = arith.constant 320 : index
    %45 = vector.load %arg1[%c0_21, %c320] : memref<8x384xbf16, #tpu.memory_space<vmem>>, vector<8x32xbf16>
    %cst_22 = arith.constant dense<0.000000e+00> : vector<8x8xf32>
    %46 = tpu.matmul %43, %44, %cst_22 {dimension_numbers = #tpu.dot_dimension_numbers<[1], [1], [0], [0], [0, 0, 1, 0], [], []>} : vector<8x32xbf16>, vector<8x32xbf16>, vector<8x8xf32> -> vector<8x8xf32>
    %cst_23 = arith.constant -1.000000e+30 : f32
    %47 = vector.broadcast %cst_23 : f32 to vector<8x8xf32>
    %48 = arith.select %2, %46, %47 : vector<8x8xi1>, vector<8x8xf32>
    %cst_24 = arith.constant dense<0xFF800000> : vector<8xf32>
    %49 = vector.multi_reduction <maximumf>, %48, %cst_24 [1] : vector<8x8xf32> to vector<8xf32>
    %50 = vector.shape_cast %49 : vector<8xf32> to vector<8x1xf32>
    %51 = vector.broadcast %50 : vector<8x1xf32> to vector<8x8xf32>
    %52 = arith.subf %48, %51 : vector<8x8xf32>
    %53 = math.exp %52 : vector<8x8xf32>
    %cst_25 = arith.constant dense<0.000000e+00> : vector<8xf32>
    %54 = vector.multi_reduction <add>, %53, %cst_25 [1] : vector<8x8xf32> to vector<8xf32>
    %55 = vector.shape_cast %54 : vector<8xf32> to vector<8x1xf32>
    %56 = tpu.reciprocal %55 {approx = true} : vector<8x1xf32> -> vector<8x1xf32>
    %57 = vector.broadcast %56 : vector<8x1xf32> to vector<8x8xf32>
    %58 = arith.mulf %53, %57 : vector<8x8xf32>
    %59 = arith.truncf %58 : vector<8x8xf32> to vector<8x8xbf16>
    %cst_26 = arith.constant dense<0.000000e+00> : vector<8x32xf32>
    %60 = tpu.matmul %59, %45, %cst_26 {dimension_numbers = #tpu.dot_dimension_numbers<[1], [0], [0], [1], [0, 0, 1, 1], [], []>} : vector<8x8xbf16>, vector<8x32xbf16>, vector<8x32xf32> -> vector<8x32xf32>
    %61 = arith.truncf %60 : vector<8x32xf32> to vector<8x32xbf16>
    %c0_27 = arith.constant 0 : index
    %c64_28 = arith.constant 64 : index
    %62 = vector.load %arg2[%c0_27, %c64_28] : memref<8x128xbf16, #tpu.memory_space<vmem>>, vector<8x32xbf16>
    tpu.vector_store %arg2[%c0_27, %c64_28], %61 {strides = array<i32>} : memref<8x128xbf16, #tpu.memory_space<vmem>>, vector<8x32xbf16>,
    %c0_29 = arith.constant 0 : index
    %c96 = arith.constant 96 : index
    %63 = vector.load %arg1[%c0_29, %c96] : memref<8x384xbf16, #tpu.memory_space<vmem>>, vector<8x32xbf16>
    %c0_30 = arith.constant 0 : index
    %c224 = arith.constant 224 : index
    %64 = vector.load %arg1[%c0_30, %c224] : memref<8x384xbf16, #tpu.memory_space<vmem>>, vector<8x32xbf16>
    %c0_31 = arith.constant 0 : index
    %c352 = arith.constant 352 : index
    %65 = vector.load %arg1[%c0_31, %c352] : memref<8x384xbf16, #tpu.memory_space<vmem>>, vector<8x32xbf16>
    %cst_32 = arith.constant dense<0.000000e+00> : vector<8x8xf32>
    %66 = tpu.matmul %63, %64, %cst_32 {dimension_numbers = #tpu.dot_dimension_numbers<[1], [1], [0], [0], [0, 0, 1, 0], [], []>} : vector<8x32xbf16>, vector<8x32xbf16>, vector<8x8xf32> -> vector<8x8xf32>
    %cst_33 = arith.constant -1.000000e+30 : f32
    %67 = vector.broadcast %cst_33 : f32 to vector<8x8xf32>
    %68 = arith.select %2, %66, %67 : vector<8x8xi1>, vector<8x8xf32>
    %cst_34 = arith.constant dense<0xFF800000> : vector<8xf32>
    %69 = vector.multi_reduction <maximumf>, %68, %cst_34 [1] : vector<8x8xf32> to vector<8xf32>
    %70 = vector.shape_cast %69 : vector<8xf32> to vector<8x1xf32>
    %71 = vector.broadcast %70 : vector<8x1xf32> to vector<8x8xf32>
    %72 = arith.subf %68, %71 : vector<8x8xf32>
    %73 = math.exp %72 : vector<8x8xf32>
    %cst_35 = arith.constant dense<0.000000e+00> : vector<8xf32>
    %74 = vector.multi_reduction <add>, %73, %cst_35 [1] : vector<8x8xf32> to vector<8xf32>
    %75 = vector.shape_cast %74 : vector<8xf32> to vector<8x1xf32>
    %76 = tpu.reciprocal %75 {approx = true} : vector<8x1xf32> -> vector<8x1xf32>
    %77 = vector.broadcast %76 : vector<8x1xf32> to vector<8x8xf32>
    %78 = arith.mulf %73, %77 : vector<8x8xf32>
    %79 = arith.truncf %78 : vector<8x8xf32> to vector<8x8xbf16>
    %cst_36 = arith.constant dense<0.000000e+00> : vector<8x32xf32>
    %80 = tpu.matmul %79, %65, %cst_36 {dimension_numbers = #tpu.dot_dimension_numbers<[1], [0], [0], [1], [0, 0, 1, 1], [], []>} : vector<8x8xbf16>, vector<8x32xbf16>, vector<8x32xf32> -> vector<8x32xf32>
    %81 = arith.truncf %80 : vector<8x32xf32> to vector<8x32xbf16>
    %c0_37 = arith.constant 0 : index
    %c96_38 = arith.constant 96 : index
    %82 = vector.load %arg2[%c0_37, %c96_38] : memref<8x128xbf16, #tpu.memory_space<vmem>>, vector<8x32xbf16>
    tpu.vector_store %arg2[%c0_37, %c96_38], %81 {strides = array<i32>} : memref<8x128xbf16, #tpu.memory_space<vmem>>, vector<8x32xbf16>,
    return
  }
  func.func @transform_0(%arg0: i32) -> (i32, i32) {
    %c0_i32 = arith.constant 0 : i32
    %c0_i32_0 = arith.constant 0 : i32
    return %arg0, %c0_i32 : i32, i32
  }
  func.func @transform_1(%arg0: i32) -> (i32, i32) {
    %c0_i32 = arith.constant 0 : i32
    %c0_i32_0 = arith.constant 0 : i32
    return %arg0, %c0_i32 : i32, i32
  }
}

module attributes {stable_mosaic.version = 11 : i64} {
  func.func @_matmul_res_ln_kernel(%arg0: i32, %arg1: i32, %arg2: memref<16x128xbf16, #tpu.memory_space<vmem>>, %arg3: memref<128x128xbf16, #tpu.memory_space<vmem>>, %arg4: memref<1x128xf32, #tpu.memory_space<vmem>>, %arg5: memref<16x128xbf16, #tpu.memory_space<vmem>>, %arg6: memref<1x128xf32, #tpu.memory_space<vmem>>, %arg7: memref<1x128xf32, #tpu.memory_space<vmem>>, %arg8: memref<16x128xbf16, #tpu.memory_space<vmem>>, %arg9: memref<16x128xf32, #tpu.memory_space<vmem>>) attributes {dimension_semantics = [#tpu.dimension_semantics<parallel>, #tpu.dimension_semantics<arbitrary>], iteration_bounds = array<i64: 1, 1>, scalar_prefetch = 0 : i64, scratch_operands = 1 : i64, tpu.core_type = #tpu.core_type<tc>, window_params = [{transform_indices = @transform_0, window_bounds = array<i64: 16, 128>}, {transform_indices = @transform_1, window_bounds = array<i64: 128, 128>}, {pipeline_mode = #tpu.pipeline_mode<synchronous>, transform_indices = @transform_2, window_bounds = array<i64: 1, 128>}, {transform_indices = @transform_3, window_bounds = array<i64: 16, 128>}, {pipeline_mode = #tpu.pipeline_mode<synchronous>, transform_indices = @transform_4, window_bounds = array<i64: 1, 128>}, {pipeline_mode = #tpu.pipeline_mode<synchronous>, transform_indices = @transform_5, window_bounds = array<i64: 1, 128>}, {transform_indices = @transform_6, window_bounds = array<i64: 16, 128>}]} {
    %c0_i32 = arith.constant 0 : i32
    %0 = arith.cmpi eq, %arg1, %c0_i32 : i32
    %1 = arith.extui %0 : i1 to i32
    %c0_i32_0 = arith.constant 0 : i32
    %2 = arith.cmpi ne, %1, %c0_i32_0 : i32
    scf.if %2 {
      %cst_10 = arith.constant 0.000000e+00 : f32
      %12 = vector.broadcast %cst_10 : f32 to vector<16x128xf32>
      %c0_11 = arith.constant 0 : index
      %c0_12 = arith.constant 0 : index
      %13 = vector.load %arg9[%c0_11, %c0_12] : memref<16x128xf32, #tpu.memory_space<vmem>>, vector<16x128xf32>
      tpu.vector_store %arg9[%c0_11, %c0_12], %12 {strides = array<i32>} : memref<16x128xf32, #tpu.memory_space<vmem>>, vector<16x128xf32>,
    } else {
    }
    %c0 = arith.constant 0 : index
    %c0_1 = arith.constant 0 : index
    %3 = vector.load %arg9[%c0, %c0_1] : memref<16x128xf32, #tpu.memory_space<vmem>>, vector<16x128xf32>
    %c0_2 = arith.constant 0 : index
    %c0_3 = arith.constant 0 : index
    %4 = vector.load %arg2[%c0_2, %c0_3] : memref<16x128xbf16, #tpu.memory_space<vmem>>, vector<16x128xbf16>
    %c0_4 = arith.constant 0 : index
    %c0_5 = arith.constant 0 : index
    %5 = vector.load %arg3[%c0_4, %c0_5] : memref<128x128xbf16, #tpu.memory_space<vmem>>, vector<128x128xbf16>
    %cst = arith.constant dense<0.000000e+00> : vector<16x128xf32>
    %6 = tpu.matmul %4, %5, %cst {dimension_numbers = #tpu.dot_dimension_numbers<[1], [0], [0], [1], [0, 0, 1, 1], [], []>} : vector<16x128xbf16>, vector<128x128xbf16>, vector<16x128xf32> -> vector<16x128xf32>
    %7 = arith.addf %3, %6 : vector<16x128xf32>
    %c0_6 = arith.constant 0 : index
    %c0_7 = arith.constant 0 : index
    %8 = vector.load %arg9[%c0_6, %c0_7] : memref<16x128xf32, #tpu.memory_space<vmem>>, vector<16x128xf32>
    tpu.vector_store %arg9[%c0_6, %c0_7], %7 {strides = array<i32>} : memref<16x128xf32, #tpu.memory_space<vmem>>, vector<16x128xf32>,
    %c0_i32_8 = arith.constant 0 : i32
    %9 = arith.cmpi eq, %arg1, %c0_i32_8 : i32
    %10 = arith.extui %9 : i1 to i32
    %c0_i32_9 = arith.constant 0 : i32
    %11 = arith.cmpi ne, %10, %c0_i32_9 : i32
    scf.if %11 {
      %c0_10 = arith.constant 0 : index
      %c0_11 = arith.constant 0 : index
      %12 = vector.load %arg9[%c0_10, %c0_11] : memref<16x128xf32, #tpu.memory_space<vmem>>, vector<16x128xf32>
      %c0_12 = arith.constant 0 : index
      %c0_13 = arith.constant 0 : index
      %13 = vector.load %arg4[%c0_12, %c0_13] : memref<1x128xf32, #tpu.memory_space<vmem>>, vector<1x128xf32>
      %14 = vector.broadcast %13 : vector<1x128xf32> to vector<16x128xf32>
      %15 = arith.addf %12, %14 : vector<16x128xf32>
      %c0_14 = arith.constant 0 : index
      %c0_15 = arith.constant 0 : index
      %16 = vector.load %arg5[%c0_14, %c0_15] : memref<16x128xbf16, #tpu.memory_space<vmem>>, vector<16x128xbf16>
      %17 = arith.extf %16 : vector<16x128xbf16> to vector<16x128xf32>
      %18 = arith.addf %15, %17 : vector<16x128xf32>
      %cst_16 = arith.constant dense<0.000000e+00> : vector<16xf32>
      %19 = vector.multi_reduction <add>, %18, %cst_16 [1] : vector<16x128xf32> to vector<16xf32>
      %20 = vector.shape_cast %19 : vector<16xf32> to vector<16x1xf32>
      %cst_17 = arith.constant 1.280000e+02 : f32
      %21 = vector.broadcast %cst_17 : f32 to vector<16x1xf32>
      %22 = arith.divf %20, %21 : vector<16x1xf32>
      %23 = arith.mulf %18, %18 : vector<16x128xf32>
      %cst_18 = arith.constant dense<0.000000e+00> : vector<16xf32>
      %24 = vector.multi_reduction <add>, %23, %cst_18 [1] : vector<16x128xf32> to vector<16xf32>
      %25 = vector.shape_cast %24 : vector<16xf32> to vector<16x1xf32>
      %cst_19 = arith.constant 1.280000e+02 : f32
      %26 = vector.broadcast %cst_19 : f32 to vector<16x1xf32>
      %27 = arith.divf %25, %26 : vector<16x1xf32>
      %28 = arith.mulf %22, %22 : vector<16x1xf32>
      %29 = arith.subf %27, %28 : vector<16x1xf32>
      %30 = vector.broadcast %22 : vector<16x1xf32> to vector<16x128xf32>
      %31 = arith.subf %18, %30 : vector<16x128xf32>
      %cst_20 = arith.constant 9.99999974E-6 : f32
      %32 = vector.broadcast %cst_20 : f32 to vector<16x1xf32>
      %33 = arith.addf %29, %32 : vector<16x1xf32>
      %34 = math.rsqrt %33 : vector<16x1xf32>
      %35 = vector.broadcast %34 : vector<16x1xf32> to vector<16x128xf32>
      %36 = arith.mulf %31, %35 : vector<16x128xf32>
      %c0_21 = arith.constant 0 : index
      %c0_22 = arith.constant 0 : index
      %37 = vector.load %arg6[%c0_21, %c0_22] : memref<1x128xf32, #tpu.memory_space<vmem>>, vector<1x128xf32>
      %38 = vector.broadcast %37 : vector<1x128xf32> to vector<16x128xf32>
      %39 = arith.mulf %36, %38 : vector<16x128xf32>
      %c0_23 = arith.constant 0 : index
      %c0_24 = arith.constant 0 : index
      %40 = vector.load %arg7[%c0_23, %c0_24] : memref<1x128xf32, #tpu.memory_space<vmem>>, vector<1x128xf32>
      %41 = vector.broadcast %40 : vector<1x128xf32> to vector<16x128xf32>
      %42 = arith.addf %39, %41 : vector<16x128xf32>
      %43 = arith.truncf %42 : vector<16x128xf32> to vector<16x128xbf16>
      %c0_25 = arith.constant 0 : index
      %c0_26 = arith.constant 0 : index
      %44 = vector.load %arg8[%c0_25, %c0_26] : memref<16x128xbf16, #tpu.memory_space<vmem>>, vector<16x128xbf16>
      tpu.vector_store %arg8[%c0_25, %c0_26], %43 {strides = array<i32>} : memref<16x128xbf16, #tpu.memory_space<vmem>>, vector<16x128xbf16>,
    } else {
    }
    return
  }
  func.func @transform_0(%arg0: i32, %arg1: i32) -> (i32, i32) {
    %c0_i32 = arith.constant 0 : i32
    return %arg0, %arg1 : i32, i32
  }
  func.func @transform_1(%arg0: i32, %arg1: i32) -> (i32, i32) {
    %c0_i32 = arith.constant 0 : i32
    %c0_i32_0 = arith.constant 0 : i32
    return %arg1, %c0_i32 : i32, i32
  }
  func.func @transform_2(%arg0: i32, %arg1: i32) -> (i32, i32) {
    %c0_i32 = arith.constant 0 : i32
    %c0_i32_0 = arith.constant 0 : i32
    %c0_i32_1 = arith.constant 0 : i32
    return %c0_i32, %c0_i32_0 : i32, i32
  }
  func.func @transform_3(%arg0: i32, %arg1: i32) -> (i32, i32) {
    %c0_i32 = arith.constant 0 : i32
    %c0_i32_0 = arith.constant 0 : i32
    return %arg0, %c0_i32 : i32, i32
  }
  func.func @transform_4(%arg0: i32, %arg1: i32) -> (i32, i32) {
    %c0_i32 = arith.constant 0 : i32
    %c0_i32_0 = arith.constant 0 : i32
    %c0_i32_1 = arith.constant 0 : i32
    return %c0_i32, %c0_i32_0 : i32, i32
  }
  func.func @transform_5(%arg0: i32, %arg1: i32) -> (i32, i32) {
    %c0_i32 = arith.constant 0 : i32
    %c0_i32_0 = arith.constant 0 : i32
    %c0_i32_1 = arith.constant 0 : i32
    return %c0_i32, %c0_i32_0 : i32, i32
  }
  func.func @transform_6(%arg0: i32, %arg1: i32) -> (i32, i32) {
    %c0_i32 = arith.constant 0 : i32
    %c0_i32_0 = arith.constant 0 : i32
    return %arg0, %c0_i32 : i32, i32
  }
}

module attributes {stable_mosaic.version = 11 : i64} {
  func.func @_matmul_kernel(%arg0: i32, %arg1: i32, %arg2: i32, %arg3: memref<16x128xbf16, #tpu.memory_space<vmem>>, %arg4: memref<128x256xbf16, #tpu.memory_space<vmem>>, %arg5: memref<1x256xf32, #tpu.memory_space<vmem>>, %arg6: memref<16x256xbf16, #tpu.memory_space<vmem>>, %arg7: memref<16x256xf32, #tpu.memory_space<vmem>>) attributes {dimension_semantics = [#tpu.dimension_semantics<parallel>, #tpu.dimension_semantics<parallel>, #tpu.dimension_semantics<arbitrary>], iteration_bounds = array<i64: 1, 1, 1>, scalar_prefetch = 0 : i64, scratch_operands = 1 : i64, tpu.core_type = #tpu.core_type<tc>, window_params = [{transform_indices = @transform_0, window_bounds = array<i64: 16, 128>}, {transform_indices = @transform_1, window_bounds = array<i64: 128, 256>}, {transform_indices = @transform_2, window_bounds = array<i64: 1, 256>}, {transform_indices = @transform_3, window_bounds = array<i64: 16, 256>}]} {
    %c0_i32 = arith.constant 0 : i32
    %0 = arith.cmpi eq, %arg2, %c0_i32 : i32
    %1 = arith.extui %0 : i1 to i32
    %c0_i32_0 = arith.constant 0 : i32
    %2 = arith.cmpi ne, %1, %c0_i32_0 : i32
    scf.if %2 {
      %cst_10 = arith.constant 0.000000e+00 : f32
      %12 = vector.broadcast %cst_10 : f32 to vector<16x256xf32>
      %c0_11 = arith.constant 0 : index
      %c0_12 = arith.constant 0 : index
      %13 = vector.load %arg7[%c0_11, %c0_12] : memref<16x256xf32, #tpu.memory_space<vmem>>, vector<16x256xf32>
      tpu.vector_store %arg7[%c0_11, %c0_12], %12 {strides = array<i32>} : memref<16x256xf32, #tpu.memory_space<vmem>>, vector<16x256xf32>,
    } else {
    }
    %c0 = arith.constant 0 : index
    %c0_1 = arith.constant 0 : index
    %3 = vector.load %arg7[%c0, %c0_1] : memref<16x256xf32, #tpu.memory_space<vmem>>, vector<16x256xf32>
    %c0_2 = arith.constant 0 : index
    %c0_3 = arith.constant 0 : index
    %4 = vector.load %arg3[%c0_2, %c0_3] : memref<16x128xbf16, #tpu.memory_space<vmem>>, vector<16x128xbf16>
    %c0_4 = arith.constant 0 : index
    %c0_5 = arith.constant 0 : index
    %5 = vector.load %arg4[%c0_4, %c0_5] : memref<128x256xbf16, #tpu.memory_space<vmem>>, vector<128x256xbf16>
    %cst = arith.constant dense<0.000000e+00> : vector<16x256xf32>
    %6 = tpu.matmul %4, %5, %cst {dimension_numbers = #tpu.dot_dimension_numbers<[1], [0], [0], [1], [0, 0, 1, 1], [], []>} : vector<16x128xbf16>, vector<128x256xbf16>, vector<16x256xf32> -> vector<16x256xf32>
    %7 = arith.addf %3, %6 : vector<16x256xf32>
    %c0_6 = arith.constant 0 : index
    %c0_7 = arith.constant 0 : index
    %8 = vector.load %arg7[%c0_6, %c0_7] : memref<16x256xf32, #tpu.memory_space<vmem>>, vector<16x256xf32>
    tpu.vector_store %arg7[%c0_6, %c0_7], %7 {strides = array<i32>} : memref<16x256xf32, #tpu.memory_space<vmem>>, vector<16x256xf32>,
    %c0_i32_8 = arith.constant 0 : i32
    %9 = arith.cmpi eq, %arg2, %c0_i32_8 : i32
    %10 = arith.extui %9 : i1 to i32
    %c0_i32_9 = arith.constant 0 : i32
    %11 = arith.cmpi ne, %10, %c0_i32_9 : i32
    scf.if %11 {
      %c0_10 = arith.constant 0 : index
      %c0_11 = arith.constant 0 : index
      %12 = vector.load %arg7[%c0_10, %c0_11] : memref<16x256xf32, #tpu.memory_space<vmem>>, vector<16x256xf32>
      %c0_12 = arith.constant 0 : index
      %c0_13 = arith.constant 0 : index
      %13 = vector.load %arg5[%c0_12, %c0_13] : memref<1x256xf32, #tpu.memory_space<vmem>>, vector<1x256xf32>
      %14 = vector.broadcast %13 : vector<1x256xf32> to vector<16x256xf32>
      %15 = arith.addf %12, %14 : vector<16x256xf32>
      %cst_14 = arith.constant 0.000000e+00 : f32
      %16 = vector.broadcast %cst_14 : f32 to vector<16x256xf32>
      %17 = arith.maximumf %15, %16 : vector<16x256xf32>
      %18 = arith.truncf %17 : vector<16x256xf32> to vector<16x256xbf16>
      %c0_15 = arith.constant 0 : index
      %c0_16 = arith.constant 0 : index
      %19 = vector.load %arg6[%c0_15, %c0_16] : memref<16x256xbf16, #tpu.memory_space<vmem>>, vector<16x256xbf16>
      tpu.vector_store %arg6[%c0_15, %c0_16], %18 {strides = array<i32>} : memref<16x256xbf16, #tpu.memory_space<vmem>>, vector<16x256xbf16>,
    } else {
    }
    return
  }
  func.func @transform_0(%arg0: i32, %arg1: i32, %arg2: i32) -> (i32, i32) {
    %c0_i32 = arith.constant 0 : i32
    return %arg0, %arg2 : i32, i32
  }
  func.func @transform_1(%arg0: i32, %arg1: i32, %arg2: i32) -> (i32, i32) {
    %c0_i32 = arith.constant 0 : i32
    return %arg2, %arg1 : i32, i32
  }
  func.func @transform_2(%arg0: i32, %arg1: i32, %arg2: i32) -> (i32, i32) {
    %c0_i32 = arith.constant 0 : i32
    %c0_i32_0 = arith.constant 0 : i32
    return %c0_i32, %arg1 : i32, i32
  }
  func.func @transform_3(%arg0: i32, %arg1: i32, %arg2: i32) -> (i32, i32) {
    %c0_i32 = arith.constant 0 : i32
    return %arg0, %arg1 : i32, i32
  }
}

module attributes {stable_mosaic.version = 11 : i64} {
  func.func @_matmul_kernel(%arg0: i32, %arg1: i32, %arg2: i32, %arg3: memref<8x128xbf16, #tpu.memory_space<vmem>>, %arg4: memref<128x256xbf16, #tpu.memory_space<vmem>>, %arg5: memref<1x256xf32, #tpu.memory_space<vmem>>, %arg6: memref<8x256xf32, #tpu.memory_space<vmem>>, %arg7: memref<8x256xf32, #tpu.memory_space<vmem>>) attributes {dimension_semantics = [#tpu.dimension_semantics<parallel>, #tpu.dimension_semantics<parallel>, #tpu.dimension_semantics<arbitrary>], iteration_bounds = array<i64: 2, 1, 1>, scalar_prefetch = 0 : i64, scratch_operands = 1 : i64, tpu.core_type = #tpu.core_type<tc>, window_params = [{transform_indices = @transform_0, window_bounds = array<i64: 8, 128>}, {transform_indices = @transform_1, window_bounds = array<i64: 128, 256>}, {transform_indices = @transform_2, window_bounds = array<i64: 1, 256>}, {transform_indices = @transform_3, window_bounds = array<i64: 8, 256>}]} {
    %c0_i32 = arith.constant 0 : i32
    %0 = arith.cmpi eq, %arg2, %c0_i32 : i32
    %1 = arith.extui %0 : i1 to i32
    %c0_i32_0 = arith.constant 0 : i32
    %2 = arith.cmpi ne, %1, %c0_i32_0 : i32
    scf.if %2 {
      %cst_10 = arith.constant 0.000000e+00 : f32
      %12 = vector.broadcast %cst_10 : f32 to vector<8x256xf32>
      %c0_11 = arith.constant 0 : index
      %c0_12 = arith.constant 0 : index
      %13 = vector.load %arg7[%c0_11, %c0_12] : memref<8x256xf32, #tpu.memory_space<vmem>>, vector<8x256xf32>
      tpu.vector_store %arg7[%c0_11, %c0_12], %12 {strides = array<i32>} : memref<8x256xf32, #tpu.memory_space<vmem>>, vector<8x256xf32>,
    } else {
    }
    %c0 = arith.constant 0 : index
    %c0_1 = arith.constant 0 : index
    %3 = vector.load %arg7[%c0, %c0_1] : memref<8x256xf32, #tpu.memory_space<vmem>>, vector<8x256xf32>
    %c0_2 = arith.constant 0 : index
    %c0_3 = arith.constant 0 : index
    %4 = vector.load %arg3[%c0_2, %c0_3] : memref<8x128xbf16, #tpu.memory_space<vmem>>, vector<8x128xbf16>
    %c0_4 = arith.constant 0 : index
    %c0_5 = arith.constant 0 : index
    %5 = vector.load %arg4[%c0_4, %c0_5] : memref<128x256xbf16, #tpu.memory_space<vmem>>, vector<128x256xbf16>
    %cst = arith.constant dense<0.000000e+00> : vector<8x256xf32>
    %6 = tpu.matmul %4, %5, %cst {dimension_numbers = #tpu.dot_dimension_numbers<[1], [0], [0], [1], [0, 0, 1, 1], [], []>} : vector<8x128xbf16>, vector<128x256xbf16>, vector<8x256xf32> -> vector<8x256xf32>
    %7 = arith.addf %3, %6 : vector<8x256xf32>
    %c0_6 = arith.constant 0 : index
    %c0_7 = arith.constant 0 : index
    %8 = vector.load %arg7[%c0_6, %c0_7] : memref<8x256xf32, #tpu.memory_space<vmem>>, vector<8x256xf32>
    tpu.vector_store %arg7[%c0_6, %c0_7], %7 {strides = array<i32>} : memref<8x256xf32, #tpu.memory_space<vmem>>, vector<8x256xf32>,
    %c0_i32_8 = arith.constant 0 : i32
    %9 = arith.cmpi eq, %arg2, %c0_i32_8 : i32
    %10 = arith.extui %9 : i1 to i32
    %c0_i32_9 = arith.constant 0 : i32
    %11 = arith.cmpi ne, %10, %c0_i32_9 : i32
    scf.if %11 {
      %c0_10 = arith.constant 0 : index
      %c0_11 = arith.constant 0 : index
      %12 = vector.load %arg7[%c0_10, %c0_11] : memref<8x256xf32, #tpu.memory_space<vmem>>, vector<8x256xf32>
      %c0_12 = arith.constant 0 : index
      %c0_13 = arith.constant 0 : index
      %13 = vector.load %arg5[%c0_12, %c0_13] : memref<1x256xf32, #tpu.memory_space<vmem>>, vector<1x256xf32>
      %14 = vector.broadcast %13 : vector<1x256xf32> to vector<8x256xf32>
      %15 = arith.addf %12, %14 : vector<8x256xf32>
      %c0_14 = arith.constant 0 : index
      %c0_15 = arith.constant 0 : index
      %16 = vector.load %arg6[%c0_14, %c0_15] : memref<8x256xf32, #tpu.memory_space<vmem>>, vector<8x256xf32>
      tpu.vector_store %arg6[%c0_14, %c0_15], %15 {strides = array<i32>} : memref<8x256xf32, #tpu.memory_space<vmem>>, vector<8x256xf32>,
    } else {
    }
    return
  }
  func.func @transform_0(%arg0: i32, %arg1: i32, %arg2: i32) -> (i32, i32) {
    %c0_i32 = arith.constant 0 : i32
    return %arg0, %arg2 : i32, i32
  }
  func.func @transform_1(%arg0: i32, %arg1: i32, %arg2: i32) -> (i32, i32) {
    %c0_i32 = arith.constant 0 : i32
    return %arg2, %arg1 : i32, i32
  }
  func.func @transform_2(%arg0: i32, %arg1: i32, %arg2: i32) -> (i32, i32) {
    %c0_i32 = arith.constant 0 : i32
    %c0_i32_0 = arith.constant 0 : i32
    return %c0_i32, %arg1 : i32, i32
  }
  func.func @transform_3(%arg0: i32, %arg1: i32, %arg2: i32) -> (i32, i32) {
    %c1_i32 = arith.constant 1 : i32
    %0 = arith.muli %arg0, %c1_i32 : i32
    %1 = arith.addi %0, %arg1 : i32
    %c0_i32 = arith.constant 0 : i32
    %c0_i32_0 = arith.constant 0 : i32
    return %c0_i32, %1 : i32, i32
  }
}

module attributes {stable_mosaic.version = 11 : i64} {
  func.func @_matmul_res_ln_kernel(%arg0: i32, %arg1: i32, %arg2: memref<16x256xbf16, #tpu.memory_space<vmem>>, %arg3: memref<256x128xbf16, #tpu.memory_space<vmem>>, %arg4: memref<1x128xf32, #tpu.memory_space<vmem>>, %arg5: memref<16x128xbf16, #tpu.memory_space<vmem>>, %arg6: memref<1x128xf32, #tpu.memory_space<vmem>>, %arg7: memref<1x128xf32, #tpu.memory_space<vmem>>, %arg8: memref<16x128xbf16, #tpu.memory_space<vmem>>, %arg9: memref<16x128xf32, #tpu.memory_space<vmem>>) attributes {dimension_semantics = [#tpu.dimension_semantics<parallel>, #tpu.dimension_semantics<arbitrary>], iteration_bounds = array<i64: 1, 1>, scalar_prefetch = 0 : i64, scratch_operands = 1 : i64, tpu.core_type = #tpu.core_type<tc>, window_params = [{transform_indices = @transform_0, window_bounds = array<i64: 16, 256>}, {transform_indices = @transform_1, window_bounds = array<i64: 256, 128>}, {pipeline_mode = #tpu.pipeline_mode<synchronous>, transform_indices = @transform_2, window_bounds = array<i64: 1, 128>}, {transform_indices = @transform_3, window_bounds = array<i64: 16, 128>}, {pipeline_mode = #tpu.pipeline_mode<synchronous>, transform_indices = @transform_4, window_bounds = array<i64: 1, 128>}, {pipeline_mode = #tpu.pipeline_mode<synchronous>, transform_indices = @transform_5, window_bounds = array<i64: 1, 128>}, {transform_indices = @transform_6, window_bounds = array<i64: 16, 128>}]} {
    %c0_i32 = arith.constant 0 : i32
    %0 = arith.cmpi eq, %arg1, %c0_i32 : i32
    %1 = arith.extui %0 : i1 to i32
    %c0_i32_0 = arith.constant 0 : i32
    %2 = arith.cmpi ne, %1, %c0_i32_0 : i32
    scf.if %2 {
      %cst_10 = arith.constant 0.000000e+00 : f32
      %12 = vector.broadcast %cst_10 : f32 to vector<16x128xf32>
      %c0_11 = arith.constant 0 : index
      %c0_12 = arith.constant 0 : index
      %13 = vector.load %arg9[%c0_11, %c0_12] : memref<16x128xf32, #tpu.memory_space<vmem>>, vector<16x128xf32>
      tpu.vector_store %arg9[%c0_11, %c0_12], %12 {strides = array<i32>} : memref<16x128xf32, #tpu.memory_space<vmem>>, vector<16x128xf32>,
    } else {
    }
    %c0 = arith.constant 0 : index
    %c0_1 = arith.constant 0 : index
    %3 = vector.load %arg9[%c0, %c0_1] : memref<16x128xf32, #tpu.memory_space<vmem>>, vector<16x128xf32>
    %c0_2 = arith.constant 0 : index
    %c0_3 = arith.constant 0 : index
    %4 = vector.load %arg2[%c0_2, %c0_3] : memref<16x256xbf16, #tpu.memory_space<vmem>>, vector<16x256xbf16>
    %c0_4 = arith.constant 0 : index
    %c0_5 = arith.constant 0 : index
    %5 = vector.load %arg3[%c0_4, %c0_5] : memref<256x128xbf16, #tpu.memory_space<vmem>>, vector<256x128xbf16>
    %cst = arith.constant dense<0.000000e+00> : vector<16x128xf32>
    %6 = tpu.matmul %4, %5, %cst {dimension_numbers = #tpu.dot_dimension_numbers<[1], [0], [0], [1], [0, 0, 1, 1], [], []>} : vector<16x256xbf16>, vector<256x128xbf16>, vector<16x128xf32> -> vector<16x128xf32>
    %7 = arith.addf %3, %6 : vector<16x128xf32>
    %c0_6 = arith.constant 0 : index
    %c0_7 = arith.constant 0 : index
    %8 = vector.load %arg9[%c0_6, %c0_7] : memref<16x128xf32, #tpu.memory_space<vmem>>, vector<16x128xf32>
    tpu.vector_store %arg9[%c0_6, %c0_7], %7 {strides = array<i32>} : memref<16x128xf32, #tpu.memory_space<vmem>>, vector<16x128xf32>,
    %c0_i32_8 = arith.constant 0 : i32
    %9 = arith.cmpi eq, %arg1, %c0_i32_8 : i32
    %10 = arith.extui %9 : i1 to i32
    %c0_i32_9 = arith.constant 0 : i32
    %11 = arith.cmpi ne, %10, %c0_i32_9 : i32
    scf.if %11 {
      %c0_10 = arith.constant 0 : index
      %c0_11 = arith.constant 0 : index
      %12 = vector.load %arg9[%c0_10, %c0_11] : memref<16x128xf32, #tpu.memory_space<vmem>>, vector<16x128xf32>
      %c0_12 = arith.constant 0 : index
      %c0_13 = arith.constant 0 : index
      %13 = vector.load %arg4[%c0_12, %c0_13] : memref<1x128xf32, #tpu.memory_space<vmem>>, vector<1x128xf32>
      %14 = vector.broadcast %13 : vector<1x128xf32> to vector<16x128xf32>
      %15 = arith.addf %12, %14 : vector<16x128xf32>
      %c0_14 = arith.constant 0 : index
      %c0_15 = arith.constant 0 : index
      %16 = vector.load %arg5[%c0_14, %c0_15] : memref<16x128xbf16, #tpu.memory_space<vmem>>, vector<16x128xbf16>
      %17 = arith.extf %16 : vector<16x128xbf16> to vector<16x128xf32>
      %18 = arith.addf %15, %17 : vector<16x128xf32>
      %cst_16 = arith.constant dense<0.000000e+00> : vector<16xf32>
      %19 = vector.multi_reduction <add>, %18, %cst_16 [1] : vector<16x128xf32> to vector<16xf32>
      %20 = vector.shape_cast %19 : vector<16xf32> to vector<16x1xf32>
      %cst_17 = arith.constant 1.280000e+02 : f32
      %21 = vector.broadcast %cst_17 : f32 to vector<16x1xf32>
      %22 = arith.divf %20, %21 : vector<16x1xf32>
      %23 = arith.mulf %18, %18 : vector<16x128xf32>
      %cst_18 = arith.constant dense<0.000000e+00> : vector<16xf32>
      %24 = vector.multi_reduction <add>, %23, %cst_18 [1] : vector<16x128xf32> to vector<16xf32>
      %25 = vector.shape_cast %24 : vector<16xf32> to vector<16x1xf32>
      %cst_19 = arith.constant 1.280000e+02 : f32
      %26 = vector.broadcast %cst_19 : f32 to vector<16x1xf32>
      %27 = arith.divf %25, %26 : vector<16x1xf32>
      %28 = arith.mulf %22, %22 : vector<16x1xf32>
      %29 = arith.subf %27, %28 : vector<16x1xf32>
      %30 = vector.broadcast %22 : vector<16x1xf32> to vector<16x128xf32>
      %31 = arith.subf %18, %30 : vector<16x128xf32>
      %cst_20 = arith.constant 9.99999974E-6 : f32
      %32 = vector.broadcast %cst_20 : f32 to vector<16x1xf32>
      %33 = arith.addf %29, %32 : vector<16x1xf32>
      %34 = math.rsqrt %33 : vector<16x1xf32>
      %35 = vector.broadcast %34 : vector<16x1xf32> to vector<16x128xf32>
      %36 = arith.mulf %31, %35 : vector<16x128xf32>
      %c0_21 = arith.constant 0 : index
      %c0_22 = arith.constant 0 : index
      %37 = vector.load %arg6[%c0_21, %c0_22] : memref<1x128xf32, #tpu.memory_space<vmem>>, vector<1x128xf32>
      %38 = vector.broadcast %37 : vector<1x128xf32> to vector<16x128xf32>
      %39 = arith.mulf %36, %38 : vector<16x128xf32>
      %c0_23 = arith.constant 0 : index
      %c0_24 = arith.constant 0 : index
      %40 = vector.load %arg7[%c0_23, %c0_24] : memref<1x128xf32, #tpu.memory_space<vmem>>, vector<1x128xf32>
      %41 = vector.broadcast %40 : vector<1x128xf32> to vector<16x128xf32>
      %42 = arith.addf %39, %41 : vector<16x128xf32>
      %43 = arith.truncf %42 : vector<16x128xf32> to vector<16x128xbf16>
      %c0_25 = arith.constant 0 : index
      %c0_26 = arith.constant 0 : index
      %44 = vector.load %arg8[%c0_25, %c0_26] : memref<16x128xbf16, #tpu.memory_space<vmem>>, vector<16x128xbf16>
      tpu.vector_store %arg8[%c0_25, %c0_26], %43 {strides = array<i32>} : memref<16x128xbf16, #tpu.memory_space<vmem>>, vector<16x128xbf16>,
    } else {
    }
    return
  }
  func.func @transform_0(%arg0: i32, %arg1: i32) -> (i32, i32) {
    %c0_i32 = arith.constant 0 : i32
    return %arg0, %arg1 : i32, i32
  }
  func.func @transform_1(%arg0: i32, %arg1: i32) -> (i32, i32) {
    %c0_i32 = arith.constant 0 : i32
    %c0_i32_0 = arith.constant 0 : i32
    return %arg1, %c0_i32 : i32, i32
  }
  func.func @transform_2(%arg0: i32, %arg1: i32) -> (i32, i32) {
    %c0_i32 = arith.constant 0 : i32
    %c0_i32_0 = arith.constant 0 : i32
    %c0_i32_1 = arith.constant 0 : i32
    return %c0_i32, %c0_i32_0 : i32, i32
  }
  func.func @transform_3(%arg0: i32, %arg1: i32) -> (i32, i32) {
    %c0_i32 = arith.constant 0 : i32
    %c0_i32_0 = arith.constant 0 : i32
    return %arg0, %c0_i32 : i32, i32
  }
  func.func @transform_4(%arg0: i32, %arg1: i32) -> (i32, i32) {
    %c0_i32 = arith.constant 0 : i32
    %c0_i32_0 = arith.constant 0 : i32
    %c0_i32_1 = arith.constant 0 : i32
    return %c0_i32, %c0_i32_0 : i32, i32
  }
  func.func @transform_5(%arg0: i32, %arg1: i32) -> (i32, i32) {
    %c0_i32 = arith.constant 0 : i32
    %c0_i32_0 = arith.constant 0 : i32
    %c0_i32_1 = arith.constant 0 : i32
    return %c0_i32, %c0_i32_0 : i32, i32
  }
  func.func @transform_6(%arg0: i32, %arg1: i32) -> (i32, i32) {
    %c0_i32 = arith.constant 0 : i32
    %c0_i32_0 = arith.constant 0 : i32
    return %arg0, %c0_i32 : i32, i32
  }
}

</mosaic_0001>

<bundles_post_ra>
// kernel: transformer_forward.13
= control target key start
LH: loop header
LB: loop body
LE: loop exit
PB: predicated region body
PF: predicated region fallthrough
CT: control target
= control target key end

     0   :  { %11 = vsyncpa [#allocation4], 0  ;;  %s556_s0 = inlined_call_operand.vmem [shape: bf16[16,128], index: 0, kind: input, shape index: {}]   ;;  %s557_s1 = inlined_call_operand.hbm [shape: bf16[128,128], index: 1, kind: input, shape index: {}]   ;;  %s558_s2 = inlined_call_operand.hbm [shape: f32[1,128], index: 2, kind: input, shape index: {}]   ;;  %s559_s3 = inlined_call_operand.vmem [shape: bf16[16,128], index: 3, kind: input, shape index: {}]   ;;  %s560_s4 = inlined_call_operand.hbm [shape: f32[1,128], index: 4, kind: input, shape index: {}]   ;;  %s561_s5 = inlined_call_operand.hbm [shape: f32[1,128], index: 5, kind: input, shape index: {}]   ;;  %s562_s6 = inlined_call_operand.vmem [shape: bf16[16,128], index: 6, kind: output, shape index: {}]  }
   0x1   :  { %12 = vsyncpa [#allocation6], 0 }
   0x2   :  { %13 = vsyncpa [#allocation9], 0  ;;  %s449_s21 = smov [#allocation5]   ;;  %s450_s23 = smov [#allocation3]  }
   0x3   :  { %s34_s22 = sshll.u32 %s449_s21, 4  ;;  %s21_s24 = sshll.u32 %s450_s23, 4  ;;  %s35_s22 = int_to_ptr.vmem [resolvable:$true] %s34_s22  ;;  %s492_s24 = int_to_ptr.vmem [resolvable:$true] %s21_s24 }
   0x4   :  { %s355_s27 = scalar_lea.hbm %s558_s2, 16 }
   0x5   :  { %p356_p0 = scmp.ne.s32.totalorder %s558_s2, %s355_s27  ;;  %p359_p1 = scmp.lt.u32.totalorder %s355_s27, %s558_s2 }
   0x7   :  { %p361_p2 = pnand %p359_p1, %p356_p0 }
   0x9   :  { %364 = shalt.err (!%p361_p2)
}
   0xa   :  { %s365_s8 = scalar_lea.vmem %s35_s22, 16  ;;  %s369_s9 = scalar_lea.vmem %s35_s22, 32 }
   0xb   :  { %p366_p3 = scmp.ne.s32.totalorder %s35_s22, %s365_s8  ;;  %p370_p4 = scmp.lt.s32.totalorder %s35_s22, %s35_s22 }
   0xc   :  { %p371_p5 = scmp.lt.s32.totalorder %s369_s9, %s365_s8 }
   0xe   :  { %p372_p6 = por %p371_p5, %p370_p4 }
  0x10   :  { %p373_p7 = pnand %p372_p6, %p366_p3 }
  0x12   :  { %376 = shalt.err (!%p373_p7)
}
  0x13   :  { %37 = dma.hbm_to_vmem [thread:$0]  %s558_s2, 16, %s35_s22, [#allocation6]  }
  0x14   :  { %s377_s14 = scalar_lea.hbm %s557_s1, 1024 }
  0x15   :  { %p378_p8 = scmp.ne.s32.totalorder %s557_s1, %s377_s14  ;;  %p381_p9 = scmp.lt.u32.totalorder %s377_s14, %s557_s1 }
  0x17   :  { %p383_p10 = pnand %p381_p9, %p378_p8 }
  0x19   :  { %386 = shalt.err (!%p383_p10)
}
  0x1a   :  { %s387_s19 = scalar_lea.vmem %s492_s24, 1024  ;;  %p392_p12 = scmp.lt.s32.totalorder %s492_s24, %s492_s24 }
  0x1b   :  { %p388_p11 = scmp.ne.s32.totalorder %s492_s24, %s387_s19  ;;  %p393_p13 = scmp.lt.s32.totalorder %s387_s19, %s387_s19 }
  0x1d   :  { %p394_p0 = por %p393_p13, %p392_p12 }
  0x1f   :  { %p395_p1 = pnand %p394_p0, %p388_p11 }
  0x21   :  { %398 = shalt.err (!%p395_p1)
}
  0x22   :  { %s451_s2 = smov 64   ;;  %s452_s20 = smov 4  }
  0x23   :  { %27 = dma.hbm_to_vmem [thread:$0]  %s557_s1, 1024, %s492_s24, [#allocation4], %s451_s2, %s451_s2, %s452_s20  }
  0x24   :  { %s453_s23 = smov [#allocation7]   ;;  %s454_s26 = smov [#allocation8]  }
  0x25   :  { %s46_s25 = sshll.u32 %s453_s23, 4  ;;  %s56_s27 = sshll.u32 %s454_s26, 4  ;;  %s47_s25 = int_to_ptr.vmem [resolvable:$true] %s46_s25  ;;  %s57_s27 = int_to_ptr.vmem [resolvable:$true] %s56_s27 }
  0x26   :  { %s399_s30 = scalar_lea.hbm %s560_s4, 16 }
  0x27   :  { %p400_p2 = scmp.ne.s32.totalorder %s560_s4, %s399_s30  ;;  %p403_p3 = scmp.lt.u32.totalorder %s399_s30, %s560_s4 }
  0x29   :  { %p405_p4 = pnand %p403_p3, %p400_p2 }
  0x2b   :  { %408 = shalt.err (!%p405_p4)
}
  0x2c   :  { %s409_s1 = scalar_lea.vmem %s47_s25, 16  ;;  %s413_s24 = scalar_lea.vmem %s47_s25, 32 }
  0x2d   :  { %p410_p5 = scmp.ne.s32.totalorder %s47_s25, %s409_s1  ;;  %p414_p6 = scmp.lt.s32.totalorder %s47_s25, %s47_s25 }
  0x2e   :  { %p415_p7 = scmp.lt.s32.totalorder %s413_s24, %s409_s1 }
  0x30   :  { %p416_p8 = por %p415_p7, %p414_p6 }
  0x32   :  { %p417_p9 = pnand %p416_p8, %p410_p5 }
  0x34   :  { %420 = shalt.err (!%p417_p9)
}
  0x35   :  { %49 = dma.hbm_to_vmem [thread:$0]  %s560_s4, 16, %s47_s25, [#allocation6]  }
  0x36   :  { %s421_s15 = scalar_lea.hbm %s561_s5, 16 }
  0x37   :  { %p422_p10 = scmp.ne.s32.totalorder %s561_s5, %s421_s15  ;;  %p425_p11 = scmp.lt.u32.totalorder %s421_s15, %s561_s5 }
  0x39   :  { %p427_p12 = pnand %p425_p11, %p422_p10 }
  0x3b   :  { %430 = shalt.err (!%p427_p12)
}
  0x3c   :  { %s431_s2 = scalar_lea.vmem %s57_s27, 16  ;;  %s435_s20 = scalar_lea.vmem %s57_s27, 32 }
  0x3d   :  { %p432_p13 = scmp.ne.s32.totalorder %s57_s27, %s431_s2  ;;  %p436_p0 = scmp.lt.s32.totalorder %s57_s27, %s57_s27 }
  0x3e   :  { %p437_p1 = scmp.lt.s32.totalorder %s435_s20, %s431_s2 }
  0x40   :  { %p438_p2 = por %p437_p1, %p436_p0 }
  0x42   :  { %p439_p3 = pnand %p438_p2, %p432_p13 }
  0x44   :  { %442 = shalt.err (!%p439_p3)
}
  0x45   :  { %59 = dma.hbm_to_vmem [thread:$0]  %s561_s5, 16, %s57_s27, [#allocation9]  }
  0x46   :  { %443 = dma.done.wait [#allocation4], 1024  }
  0x47   :  { %444 = vsyncadd [#allocation4], 4294966272 }
  0x48   :  { %445 = dma.done.wait [#allocation6], 32  }
  0x49   :  { %446 = vsyncadd [#allocation6], 4294967264 }
  0x4a   :  { %447 = dma.done.wait [#allocation9], 16  }
  0x4b   :  { %448 = vsyncadd [#allocation9], 4294967280  ;;  %v455_v0 = vmov 0.0   ;;  %vm456_vm0 = vmmov 0   ;;  %v342_v1 = vld [vmem:[#allocation3] sm:$0xff]   ;;  %v343_v2 = vld [vmem:[#allocation3 + $0x8] sm:$0xff]  }
  0x4c   :  { %314 = vmatprep.subr.bf16.mxu0 %v455_v0  ;;  %330 = vmatprep.mubr.msk.bf16.mxu0 %vm456_vm0, %v455_v0  ;;  %v344_v3 = vld [vmem:[#allocation3 + $0x10] sm:$0xff]   ;;  %v345_v4 = vld [vmem:[#allocation3 + $0x18] sm:$0xff]   ;;  %v346_v5 = vld [vmem:[#allocation3 + $0x20] sm:$0xff]  }
  0x4d   :  { %315 = vmatpush3.bf16.msra.mxu0 %v342_v1  ;;  %v347_v6 = vld [vmem:[#allocation3 + $0x28] sm:$0xff]   ;;  %v348_v7 = vld [vmem:[#allocation3 + $0x30] sm:$0xff]   ;;  %v349_v8 = vld [vmem:[#allocation3 + $0x38] sm:$0xff]  }
  0x4e   :  { %316 = vmatprep.subr.bf16.mxu0 %v455_v0  ;;  %v350_v9 = vld [vmem:[%s556_s0] sm:$0xff]  }
  0x4f   :  { %v297_v10 = vld [vmem:[%s559_s3] sm:$0xff]  }
  0x50   :  { %v289_v11 = vld [vmem:[#allocation5] ss:$0 sm:$0xff]  ;;  %v298_v12 = vunpack.c.l.bf16 %v297_v10  ;;  %v299_v16 = vunpack.c.h.bf16 %v297_v10  ;;  %v290_v41 = vld [vmem:[#allocation7] ss:$0 sm:$0xff]  ;;  %v291_v46 = vld [vmem:[#allocation8] ss:$0 sm:$0xff] }
  0x51   :  { %317 = vmatpush3.bf16.msra.mxu0 %v343_v2 }
  0x52   :  { %318 = vmatprep.subr.bf16.mxu0 %v455_v0 }
  0x55   :  { %319 = vmatpush3.bf16.msra.mxu0 %v344_v3 }
  0x56   :  { %320 = vmatprep.subr.bf16.mxu0 %v455_v0 }
  0x59   :  { %321 = vmatpush3.bf16.msra.mxu0 %v345_v4 }
  0x5a   :  { %322 = vmatprep.subr.bf16.mxu0 %v455_v0 }
  0x5d   :  { %323 = vmatpush3.bf16.msra.mxu0 %v346_v5 }
  0x5e   :  { %324 = vmatprep.subr.bf16.mxu0 %v455_v0 }
  0x61   :  { %325 = vmatpush3.bf16.msra.mxu0 %v347_v6 }
  0x62   :  { %326 = vmatprep.subr.bf16.mxu0 %v455_v0 }
  0x65   :  { %327 = vmatpush3.bf16.msra.mxu0 %v348_v7 }
  0x66   :  { %328 = vmatprep.subr.bf16.mxu0 %v455_v0 }
  0x69   :  { %329 = vmatpush3.bf16.msra.mxu0 %v349_v8 }
  0x6c   :  { %331 = vmatmul.mubr.bf16.vlgmr.msra.gmra.mrb[0].mxu0 %v350_v9 }
 0x13f   :  { %v187_v13 = vpop.f32.mrb[0].mxu0 }
 0x140   :  { %v210_v14 = vadd.f32 %v289_v11, %v187_v13  ;;  %v332_v15 = vpop.f32.mrb[1].mxu0 }
 0x141   :  { %v190_v17 = vpop.f32.mrb[2].mxu0 }
 0x142   :  { %v216_v18 = vadd.f32 %v298_v12, %v210_v14  ;;  %v211_v19 = vadd.f32 %v289_v11, %v190_v17  ;;  %v333_v20 = vpop.f32.mrb[3].mxu0 }
 0x144   :  { %v217_v21 = vadd.f32 %v299_v16, %v211_v19  ;;  %218 = vadd.xlane.f32.xlu0 %v216_v18  ;;  %v225_v22 = vmul.f32 %v216_v18, %v216_v18 }
 0x146   :  { %227 = vadd.xlane.f32.xlu1 %v225_v22  ;;  %v226_v23 = vmul.f32 %v217_v21, %v217_v21 }
 0x148   :  { %220 = vadd.xlane.f32.xlu0 %v217_v21 }
 0x14a   :  { %229 = vadd.xlane.f32.xlu1 %v226_v23 }
 0x1d1   :  { %v219_v24 = vpop.xlane.xlu0 %218 }
 0x1d2   :  { %v223_v25 = vmul.f32 0.0078125, %v219_v24 }
 0x1d3   :  { %v228_v26 = vpop.xlane.xlu1 %227 }
 0x1d4   :  { %v233_v27 = vmul.f32 %v223_v25, %v223_v25  ;;  %v231_v28 = vmul.f32 0.0078125, %v228_v26  ;;  %v237_v38 = vsub.f32 %v216_v18, %v223_v25 }
 0x1d5   :  { %v221_v29 = vpop.xlane.xlu0 %220 }
 0x1d6   :  { %v235_v30 = vsub.f32 %v231_v28, %v233_v27  ;;  %v224_v31 = vmul.f32 0.0078125, %v221_v29 }
 0x1d7   :  { %v230_v32 = vpop.xlane.xlu1 %229 }
 0x1d8   :  { %v239_v33 = vadd.f32 1e-05, %v235_v30  ;;  %v234_v34 = vmul.f32 %v224_v31, %v224_v31  ;;  %v232_v35 = vmul.f32 0.0078125, %v230_v32  ;;  %v238_v42 = vsub.f32 %v217_v21, %v224_v31 }
 0x1da   :  { %351 = vrsqrt.f32 %v239_v33  ;;  %v236_v36 = vsub.f32 %v232_v35, %v234_v34 }
 0x1dc   :  { %v240_v37 = vadd.f32 1e-05, %v236_v36 }
 0x1de   :  { %353 = vrsqrt.f32 %v240_v37 }
 0x1e4   :  { %v352_v39 = vpop.eup %351 }
 0x1e5   :  { %v243_v40 = vmul.f32 %v352_v39, %v237_v38 }
 0x1e7   :  { %v252_v44 = vmul.f32 %v290_v41, %v243_v40 }
 0x1e8   :  { %v354_v43 = vpop.eup %353 }
 0x1e9   :  { %v244_v45 = vmul.f32 %v354_v43, %v238_v42  ;;  %v261_v48 = vadd.f32 %v291_v46, %v252_v44 }
 0x1eb   :  { %v253_v47 = vmul.f32 %v290_v41, %v244_v45 }
 0x1ed   :  { %v262_v49 = vadd.f32 %v291_v46, %v253_v47 }
 0x1ef   :  { %v303_v50 = vpack.c.bf16 %v262_v49, %v261_v48 }
 0x1f1   :  { %304 = vst [vmem:[%s562_s6] sm:$0xff] %v303_v50  }
 0x1f2   :  { %277 = vsyncpa [#allocation4], 1 }
 0x1f3   :  { %278 = vsyncpa [#allocation6], 1 }
 0x1f4   :  { %279 = vsyncpa [#allocation9], 1 }

// kernel: transformer_forward.14
= control target key start
LH: loop header
LB: loop body
LE: loop exit
PB: predicated region body
PF: predicated region fallthrough
CT: control target
= control target key end

     0   :  { %8 = vsyncpa [#allocation4], 0  ;;  %s412_s0 = inlined_call_operand.vmem [shape: bf16[16,128], index: 0, kind: input, shape index: {}]   ;;  %s413_s1 = inlined_call_operand.hbm [shape: bf16[128,256], index: 1, kind: input, shape index: {}]   ;;  %s414_s2 = inlined_call_operand.hbm [shape: f32[1,256], index: 2, kind: input, shape index: {}]   ;;  %s415_s3 = inlined_call_operand.vmem [shape: bf16[16,256], index: 3, kind: output, shape index: {}]  }
   0x1   :  { %9 = vsyncpa [#allocation6], 0  ;;  %s354_s12 = smov [#allocation3]   ;;  %s306_s16 = scalar_lea.hbm %s413_s1, 2048 }
   0x2   :  { %s17_s13 = sshll.u32 %s354_s12, 4  ;;  %p307_p0 = scmp.ne.s32.totalorder %s413_s1, %s306_s16  ;;  %s18_s13 = int_to_ptr.vmem [resolvable:$true] %s17_s13 }
   0x3   :  { %p310_p1 = scmp.lt.u32.totalorder %s306_s16, %s413_s1 }
   0x5   :  { %p312_p2 = pnand %p310_p1, %p307_p0 }
   0x7   :  { %315 = shalt.err (!%p312_p2)
}
   0x8   :  { %s316_s21 = scalar_lea.vmem %s18_s13, 2048  ;;  %p321_p4 = scmp.lt.s32.totalorder %s18_s13, %s18_s13 }
   0x9   :  { %p317_p3 = scmp.ne.s32.totalorder %s18_s13, %s316_s21  ;;  %p322_p5 = scmp.lt.s32.totalorder %s316_s21, %s316_s21 }
   0xb   :  { %p323_p6 = por %p322_p5, %p321_p4 }
   0xd   :  { %p324_p7 = pnand %p323_p6, %p317_p3 }
   0xf   :  { %327 = shalt.err (!%p324_p7)
}
  0x10   :  { %s355_s22 = smov 128   ;;  %s356_s23 = smov 8  }
  0x11   :  { %23 = dma.hbm_to_vmem [thread:$0]  %s413_s1, 2048, %s18_s13, [#allocation4], %s355_s22, %s355_s22, %s356_s23  }
  0x12   :  { %s357_s26 = smov [#allocation5]   ;;  %s328_s30 = scalar_lea.hbm %s414_s2, 32 }
  0x13   :  { %s30_s27 = sshll.u32 %s357_s26, 4  ;;  %p329_p8 = scmp.ne.s32.totalorder %s414_s2, %s328_s30  ;;  %s31_s27 = int_to_ptr.vmem [resolvable:$true] %s30_s27 }
  0x14   :  { %p332_p9 = scmp.lt.u32.totalorder %s328_s30, %s414_s2 }
  0x16   :  { %p334_p10 = pnand %p332_p9, %p329_p8 }
  0x18   :  { %337 = shalt.err (!%p334_p10)
}
  0x19   :  { %s338_s8 = scalar_lea.vmem %s31_s27, 32  ;;  %p343_p12 = scmp.lt.s32.totalorder %s31_s27, %s31_s27 }
  0x1a   :  { %p339_p11 = scmp.ne.s32.totalorder %s31_s27, %s338_s8  ;;  %p344_p13 = scmp.lt.s32.totalorder %s338_s8, %s338_s8 }
  0x1c   :  { %p345_p0 = por %p344_p13, %p343_p12 }
  0x1e   :  { %p346_p1 = pnand %p345_p0, %p339_p11 }
  0x20   :  { %349 = shalt.err (!%p346_p1)
}
  0x21   :  { %33 = dma.hbm_to_vmem [thread:$0]  %s414_s2, 32, %s31_s27, [#allocation6]  }
  0x22   :  { %350 = dma.done.wait [#allocation4], 2048  }
  0x23   :  { %351 = vsyncadd [#allocation4], 4294965248 }
  0x24   :  { %352 = dma.done.wait [#allocation6], 32  }
  0x25   :  { %353 = vsyncadd [#allocation6], 4294967264  ;;  %v358_v0 = vmov 0   ;;  %v281_v1 = vld [vmem:[#allocation3 + $0x4] ss:$8 sps:$4 sm:$0xff]   ;;  %v217_v18 = vlaneseq }
  0x26   :  { %189 = vmatprep.mubr.bf16.mxu0 %v358_v0  ;;  %v283_v2 = vld [vmem:[#allocation3] ss:$8 sps:$4 sm:$0xff]   ;;  %157 = vmatprep.subr.bf16.mxu0 %v281_v1  ;;  %v284_v3 = vld [vmem:[#allocation3 + $0x14] ss:$8 sps:$4 sm:$0xff]   ;;  %v286_v4 = vld [vmem:[#allocation3 + $0x10] ss:$8 sps:$4 sm:$0xff]  }
  0x27   :  { %158 = vmatpush1.bf16.msra.mxu0 %v283_v2  ;;  %v287_v5 = vld [vmem:[#allocation3 + $0x24] ss:$8 sps:$4 sm:$0xff]   ;;  %v289_v6 = vld [vmem:[#allocation3 + $0x20] ss:$8 sps:$4 sm:$0xff]   ;;  %v290_v7 = vld [vmem:[#allocation3 + $0x34] ss:$8 sps:$4 sm:$0xff]  }
  0x28   :  { %159 = vmatprep.subr.bf16.mxu0 %v284_v3  ;;  %v292_v8 = vld [vmem:[#allocation3 + $0x30] ss:$8 sps:$4 sm:$0xff]   ;;  %v293_v9 = vld [vmem:[#allocation3 + $0x44] ss:$8 sps:$4 sm:$0xff]   ;;  %v295_v10 = vld [vmem:[#allocation3 + $0x40] ss:$8 sps:$4 sm:$0xff]  }
  0x29   :  { %v296_v11 = vld [vmem:[#allocation3 + $0x54] ss:$8 sps:$4 sm:$0xff]   ;;  %v298_v12 = vld [vmem:[#allocation3 + $0x50] ss:$8 sps:$4 sm:$0xff]   ;;  %v299_v13 = vld [vmem:[#allocation3 + $0x64] ss:$8 sps:$4 sm:$0xff]  }
  0x2a   :  { %v301_v14 = vld [vmem:[#allocation3 + $0x60] ss:$8 sps:$4 sm:$0xff]   ;;  %v302_v15 = vld [vmem:[#allocation3 + $0x74] ss:$8 sps:$4 sm:$0xff]   ;;  %v304_v16 = vld [vmem:[#allocation3 + $0x70] ss:$8 sps:$4 sm:$0xff]  }
  0x2b   :  { %160 = vmatpush1.bf16.msra.mxu0 %v286_v4  ;;  %v305_v17 = vld [vmem:[%s412_s0] sm:$0xff]   ;;  %v218_v19 = vshrl.u32 %v217_v18, 7 }
  0x2c   :  { %161 = vmatprep.subr.bf16.mxu0 %v287_v5  ;;  %v215_v21 = vld [vmem:[#allocation5] sm:$0x3] }
  0x2d   :  { %v219_v20 = vsub.s32 0, %v218_v19  ;;  %v223_v22 = vsub.s32 1, %v218_v19 }
  0x2f   :  { %162 = vmatpush1.bf16.msra.mxu0 %v289_v6  ;;  %v220_v23 = vrot.slane %v215_v21, %v219_v20  ;;  %v224_v24 = vrot.slane %v215_v21, %v223_v22 }
  0x30   :  { %163 = vmatprep.subr.bf16.mxu0 %v290_v7 }
  0x33   :  { %164 = vmatpush1.bf16.msra.mxu0 %v292_v8 }
  0x34   :  { %165 = vmatprep.subr.bf16.mxu0 %v293_v9 }
  0x37   :  { %166 = vmatpush1.bf16.msra.mxu0 %v295_v10 }
  0x38   :  { %167 = vmatprep.subr.bf16.mxu0 %v296_v11 }
  0x3b   :  { %168 = vmatpush1.bf16.msra.mxu0 %v298_v12 }
  0x3c   :  { %169 = vmatprep.subr.bf16.mxu0 %v299_v13 }
  0x3f   :  { %170 = vmatpush1.bf16.msra.mxu0 %v301_v14 }
  0x40   :  { %171 = vmatprep.subr.bf16.mxu0 %v302_v15 }
  0x43   :  { %172 = vmatpush1.bf16.msra.mxu0 %v304_v16 }
  0x46   :  { %190 = vmatmul.mubr.bf16.vlgmr.msra.gmra.mrb[0].mxu0 %v305_v17 }
 0x119   :  { %v191_v25 = vpop.f32.mrb[0].mxu0 }
 0x11a   :  { %v227_v26 = vadd.f32 %v220_v23, %v191_v25  ;;  %v193_v27 = vpop.f32.mrb[1].mxu0 }
 0x11b   :  { %v228_v28 = vadd.f32 %v224_v24, %v193_v27  ;;  %v195_v29 = vpop.f32.mrb[2].mxu0 }
 0x11c   :  { %v231_v30 = vmax.f32 %v227_v26, 0.0  ;;  %v229_v31 = vadd.f32 %v220_v23, %v195_v29  ;;  %v197_v32 = vpop.f32.mrb[3].mxu0 }
 0x11d   :  { %v232_v33 = vmax.f32 %v228_v28, 0.0  ;;  %v230_v34 = vadd.f32 %v224_v24, %v197_v32 }
 0x11e   :  { %v233_v35 = vmax.f32 %v229_v31, 0.0 }
 0x11f   :  { %v274_v36 = vpack.c.bf16 %v232_v33, %v231_v30  ;;  %v234_v37 = vmax.f32 %v230_v34, 0.0 }
 0x121   :  { %247 = vst [vmem:[%s415_s3] sm:$0xff] %v274_v36  ;;  %v275_v38 = vpack.c.bf16 %v234_v37, %v233_v35 }
 0x123   :  { %248 = vst [vmem:[%s415_s3 + $0x8] sm:$0xff] %v275_v38 }
 0x124   :  { %253 = vsyncpa [#allocation4], 1 }
 0x125   :  { %254 = vsyncpa [#allocation6], 1 }

// kernel: transformer_forward.11
= control target key start
LH: loop header
LB: loop body
LE: loop exit
PB: predicated region body
PF: predicated region fallthrough
CT: control target
= control target key end

     0   :  { %8 = vsyncpa [#allocation4], 0  ;;  %s495_s12 = smov [#allocation3]   ;;  %s551_s0 = inlined_call_operand.vmem [shape: bf16[16,128], index: 0, kind: input, shape index: {}]   ;;  %s552_s1 = inlined_call_operand.hbm [shape: bf16[128,384], index: 1, kind: input, shape index: {}]   ;;  %s553_s2 = inlined_call_operand.vmem [shape: f32[1,384], index: 2, kind: input, shape index: {}]   ;;  %s554_s3 = inlined_call_operand.vmem [shape: bf16[16,384], index: 3, kind: output, shape index: {}]  }
   0x1   :  { %s16_s13 = sshll.u32 %s495_s12, 4  ;;  %s471_s16 = scalar_lea.hbm %s552_s1, 3072  ;;  %s17_s13 = int_to_ptr.vmem [resolvable:$true] %s16_s13 }
   0x2   :  { %p472_p0 = scmp.ne.s32.totalorder %s552_s1, %s471_s16  ;;  %p475_p1 = scmp.lt.u32.totalorder %s471_s16, %s552_s1 }
   0x4   :  { %p477_p2 = pnand %p475_p1, %p472_p0 }
   0x6   :  { %480 = shalt.err (!%p477_p2)
}
   0x7   :  { %s481_s21 = scalar_lea.vmem %s17_s13, 3072  ;;  %p486_p4 = scmp.lt.s32.totalorder %s17_s13, %s17_s13 }
   0x8   :  { %p482_p3 = scmp.ne.s32.totalorder %s17_s13, %s481_s21  ;;  %p487_p5 = scmp.lt.s32.totalorder %s481_s21, %s481_s21 }
   0xa   :  { %p488_p6 = por %p487_p5, %p486_p4 }
   0xc   :  { %p489_p7 = pnand %p488_p6, %p482_p3 }
   0xe   :  { %492 = shalt.err (!%p489_p7)
}
   0xf   :  { %s496_s22 = smov 192   ;;  %s497_s23 = smov 12  }
  0x10   :  { %22 = dma.hbm_to_vmem [thread:$0]  %s552_s1, 3072, %s17_s13, [#allocation4], %s496_s22, %s496_s22, %s497_s23  }
  0x11   :  { %493 = dma.done.wait [#allocation4], 3072  }
  0x12   :  { %494 = vsyncadd [#allocation4], 4294964224  ;;  %v498_v0 = vmov 0.0   ;;  %vm499_vm0 = vmmov 0   ;;  %v500_v1 = vmov 0   ;;  %v470_v26 = vld [vmem:[%s551_s0] sm:$0xff]   ;;  %v320_v27 = vlaneseq }
  0x13   :  { %412 = vmatprep.subr.bf16.mxu1 %v498_v0  ;;  %428 = vmatprep.mubr.msk.bf16.mxu1 %vm499_vm0, %v498_v0  ;;  %v438_v2 = vld [vmem:[#allocation3 + $0x4] ss:$12 sps:$4 sm:$0xff]   ;;  %v440_v3 = vld [vmem:[#allocation3 + $0x8] ss:$12 sps:$4 sm:$0xff]   ;;  %v441_v4 = vld [vmem:[#allocation3] ss:$12 sps:$4 sm:$0xff]  }
  0x14   :  { %245 = vmatprep.mubr.bf16.mxu0 %v500_v1  ;;  %213 = vmatprep.subr.bf16.mxu0 %v438_v2  ;;  %v442_v5 = vld [vmem:[#allocation3 + $0x1c] ss:$12 sps:$4 sm:$0xff]   ;;  %v444_v6 = vld [vmem:[#allocation3 + $0x20] ss:$12 sps:$4 sm:$0xff]   ;;  %v445_v7 = vld [vmem:[#allocation3 + $0x18] ss:$12 sps:$4 sm:$0xff]  }
  0x15   :  { %413 = vmatpush3.bf16.msra.mxu1 %v440_v3  ;;  %214 = vmatpush1.bf16.msra.mxu0 %v441_v4  ;;  %v446_v8 = vld [vmem:[#allocation3 + $0x34] ss:$12 sps:$4 sm:$0xff]   ;;  %v448_v9 = vld [vmem:[#allocation3 + $0x38] ss:$12 sps:$4 sm:$0xff]   ;;  %v449_v10 = vld [vmem:[#allocation3 + $0x30] ss:$12 sps:$4 sm:$0xff]  }
  0x16   :  { %414 = vmatprep.subr.bf16.mxu1 %v498_v0  ;;  %215 = vmatprep.subr.bf16.mxu0 %v442_v5  ;;  %v450_v11 = vld [vmem:[#allocation3 + $0x4c] ss:$12 sps:$4 sm:$0xff]   ;;  %v452_v12 = vld [vmem:[#allocation3 + $0x50] ss:$12 sps:$4 sm:$0xff]   ;;  %v453_v13 = vld [vmem:[#allocation3 + $0x48] ss:$12 sps:$4 sm:$0xff]  }
  0x17   :  { %v454_v14 = vld [vmem:[#allocation3 + $0x64] ss:$12 sps:$4 sm:$0xff]   ;;  %v456_v15 = vld [vmem:[#allocation3 + $0x68] ss:$12 sps:$4 sm:$0xff]   ;;  %v457_v16 = vld [vmem:[#allocation3 + $0x60] ss:$12 sps:$4 sm:$0xff]  }
  0x18   :  { %v458_v17 = vld [vmem:[#allocation3 + $0x7c] ss:$12 sps:$4 sm:$0xff]   ;;  %v460_v18 = vld [vmem:[#allocation3 + $0x80] ss:$12 sps:$4 sm:$0xff]   ;;  %v461_v19 = vld [vmem:[#allocation3 + $0x78] ss:$12 sps:$4 sm:$0xff]  }
  0x19   :  { %415 = vmatpush3.bf16.msra.mxu1 %v444_v6  ;;  %216 = vmatpush1.bf16.msra.mxu0 %v445_v7  ;;  %v462_v20 = vld [vmem:[#allocation3 + $0x94] ss:$12 sps:$4 sm:$0xff]   ;;  %v464_v21 = vld [vmem:[#allocation3 + $0x98] ss:$12 sps:$4 sm:$0xff]   ;;  %v465_v22 = vld [vmem:[#allocation3 + $0x90] ss:$12 sps:$4 sm:$0xff]  }
  0x1a   :  { %416 = vmatprep.subr.bf16.mxu1 %v498_v0  ;;  %217 = vmatprep.subr.bf16.mxu0 %v446_v8  ;;  %v466_v23 = vld [vmem:[#allocation3 + $0xac] ss:$12 sps:$4 sm:$0xff]   ;;  %v468_v24 = vld [vmem:[#allocation3 + $0xb0] ss:$12 sps:$4 sm:$0xff]   ;;  %v469_v25 = vld [vmem:[#allocation3 + $0xa8] ss:$12 sps:$4 sm:$0xff]  }
  0x1b   :  { %v321_v28 = vshrl.u32 %v320_v27, 7  ;;  %v318_v30 = vld [vmem:[%s553_s2] sm:$0x7] }
  0x1d   :  { %417 = vmatpush3.bf16.msra.mxu1 %v448_v9  ;;  %218 = vmatpush1.bf16.msra.mxu0 %v449_v10  ;;  %v330_v29 = vsub.s32 2, %v321_v28  ;;  %v322_v31 = vsub.s32 0, %v321_v28  ;;  %v326_v32 = vsub.s32 1, %v321_v28 }
  0x1e   :  { %418 = vmatprep.subr.bf16.mxu1 %v498_v0  ;;  %219 = vmatprep.subr.bf16.mxu0 %v450_v11 }
  0x1f   :  { %v331_v33 = vrot.slane %v318_v30, %v330_v29  ;;  %v323_v34 = vrot.slane %v318_v30, %v322_v31  ;;  %v327_v35 = vrot.slane %v318_v30, %v326_v32 }
  0x21   :  { %419 = vmatpush3.bf16.msra.mxu1 %v452_v12  ;;  %220 = vmatpush1.bf16.msra.mxu0 %v453_v13 }
  0x22   :  { %420 = vmatprep.subr.bf16.mxu1 %v498_v0  ;;  %221 = vmatprep.subr.bf16.mxu0 %v454_v14 }
  0x25   :  { %421 = vmatpush3.bf16.msra.mxu1 %v456_v15  ;;  %222 = vmatpush1.bf16.msra.mxu0 %v457_v16 }
  0x26   :  { %422 = vmatprep.subr.bf16.mxu1 %v498_v0  ;;  %223 = vmatprep.subr.bf16.mxu0 %v458_v17 }
  0x29   :  { %423 = vmatpush3.bf16.msra.mxu1 %v460_v18  ;;  %224 = vmatpush1.bf16.msra.mxu0 %v461_v19 }
  0x2a   :  { %424 = vmatprep.subr.bf16.mxu1 %v498_v0  ;;  %225 = vmatprep.subr.bf16.mxu0 %v462_v20 }
  0x2d   :  { %425 = vmatpush3.bf16.msra.mxu1 %v464_v21  ;;  %226 = vmatpush1.bf16.msra.mxu0 %v465_v22 }
  0x2e   :  { %426 = vmatprep.subr.bf16.mxu1 %v498_v0  ;;  %227 = vmatprep.subr.bf16.mxu0 %v466_v23 }
  0x31   :  { %427 = vmatpush3.bf16.msra.mxu1 %v468_v24  ;;  %228 = vmatpush1.bf16.msra.mxu0 %v469_v25 }
  0x34   :  { %429 = vmatmul.mubr.bf16.vlgmr.msra.gmra.mrb[0].mxu1 %v470_v26  ;;  %246 = vmatmul.mubr.bf16.vlgmr.msra.gmra.mrb[0].mxu0 %v470_v26 }
 0x107   :  { %v290_v36 = vpop.f32.mrb[0].mxu1  ;;  %v247_v38 = vpop.f32.mrb[0].mxu0 }
 0x108   :  { %v337_v37 = vadd.f32 %v331_v33, %v290_v36  ;;  %v430_v39 = vpop.f32.mrb[1].mxu1  ;;  %v335_v40 = vadd.f32 %v323_v34, %v247_v38  ;;  %v249_v41 = vpop.f32.mrb[1].mxu0 }
 0x109   :  { %v293_v42 = vpop.f32.mrb[2].mxu1  ;;  %v336_v44 = vadd.f32 %v327_v35, %v249_v41  ;;  %v251_v46 = vpop.f32.mrb[2].mxu0 }
 0x10a   :  { %v400_v43 = vpack.c.bf16 %v337_v37, %v337_v37  ;;  %v340_v45 = vadd.f32 %v331_v33, %v293_v42  ;;  %v431_v47 = vpop.f32.mrb[3].mxu1  ;;  %v338_v48 = vadd.f32 %v323_v34, %v251_v46  ;;  %v253_v49 = vpop.f32.mrb[3].mxu0 }
 0x10b   :  { %v399_v50 = vpack.c.bf16 %v336_v44, %v335_v40  ;;  %v339_v52 = vadd.f32 %v327_v35, %v253_v49 }
 0x10c   :  { %362 = vst [vmem:[%s554_s3 + $0x8] sm:$0xf] %v400_v43  ;;  %v402_v51 = vpack.c.bf16 %v340_v45, %v340_v45 }
 0x10d   :  { %361 = vst [vmem:[%s554_s3] sm:$0xff] %v399_v50  ;;  %v401_v53 = vpack.c.bf16 %v339_v52, %v338_v48 }
 0x10e   :  { %364 = vst [vmem:[%s554_s3 + $0x14] sm:$0xf] %v402_v51 }
 0x10f   :  { %363 = vst [vmem:[%s554_s3 + $0xc] sm:$0xff] %v401_v53 }
 0x110   :  { %369 = vsyncpa [#allocation4], 1 }

// kernel: transformer_forward.12
= control target key start
LH: loop header
LB: loop body
LE: loop exit
PB: predicated region body
PF: predicated region fallthrough
CT: control target
= control target key end

     0   :  { %s842_s6 = smov 0   ;;  %s961_s0 = inlined_call_operand.vmem [shape: bf16[16,384], index: 0, kind: input, shape index: {}]   ;;  %s962_s1 = inlined_call_operand.vmem [shape: bf16[16,128], index: 1, kind: output, shape index: {}]  }
   0x1 LB: > { %s684_s7 = sadd.s32 4294967295, %s825_s6   ;;  %p688_p0 = scmp.ge.s32.totalorder %s825_s6, 1  ;;  %s825_s6 = sphi %s842_s6, %s11_s6  }
   0x2   : > { %p87_p1 = scmp.lt.s32.totalorder %s825_s6, 3 }
   0x4   : > { %p88_p2 = pnand %p688_p0, %p87_p1 }
   0x5   : > { %p106_p3 = scmp.lt.s32.totalorder (!%p88_p2), %s684_s7, 1  ;;  %v827_v0 = vmov (!%p88_p2), 0.0   ;;  %vm828_vm0 = vmmov (!%p88_p2), 0   ;;  %vm124_vm1 = vcmask (!%p88_p2), 261120   ;;  %v116_v4 = vlaneseq (!%p88_p2)  ;;  %s829_s12 = smov (!%p88_p2), 96  }
   0x6   : > { %91 = sbr.rel (%p88_p2) target bundleno = 1475 (0x5c3), region = 24  ;;  %732 = vmatprep.subr.bf16.mxu0 (!%p88_p2), %v827_v0  ;;  %734 = vmatprep.mubr.msk.bf16.mxu0 (!%p88_p2), %vm828_vm0, %v827_v0  ;;  %vm172_vm3 = vcmask (!%p88_p2), 64512   ;;  %s830_s13 = smov (!%p88_p2), 64   ;;  %vm188_vm4 = vcmask (!%p88_p2), 1043456   ;;  %vm233_vm5 = vcmask (!%p88_p2), 257024   ;;  %vm365_vm6 = vcmask (!%p88_p2), 519424  }
   0x7   : > { %738 = vmatprep.subr.bf16.mxu1 (!%p88_p2), %v827_v0  ;;  %740 = vmatprep.mubr.msk.bf16.mxu1 (!%p88_p2), %vm828_vm0, %v827_v0  ;;  %v871_v5 = vshrl.u32 (!%p88_p2), %v116_v4, 7  ;;  %v873_v6 = vand.u32 (!%p88_p2), 127, %v116_v4  ;;  %s831_s14 = smov (!%p88_p2), 32   ;;  %vm497_vm7 = vcmask (!%p88_p2), 781824   ;;  %vm629_vm8 = vcmask (!%p88_p2), 1044224  }
   0x9   : > { %vm120_vm2 = vcmp.ge.s32.totalorder (!%p88_p2), %v871_v5, %v873_v6 }
   0xd   : > { %s964_s7 = smov (!%p106_p3, %s684_s7), 1 }
   0xe   : > { %s780_s8 = smul.u32 12, %s964_s7  ;;  %s690_s15 = sshll.u32 %s964_s7, 2 }
   0xf   : > { %s916_s18 = scalar_lea.vmem %s962_s1, %s690_s15 }
  0x10   : > { %s862_s11 = scalar_lea.vmem %s961_s0, %s780_s8 }
  0x11   : > { %v122_v1 = vld [vmem:[%s862_s11 + $0x4] sm:$0xf]  ;;  %v121_v3 = vld [vmem:[%s862_s11] sm:$0xf]  ;;  %v123_v23 = vld [vmem:[%s862_s11 + $0x8] sm:$0xf] }
  0x12   : > { %v129_v2 = vsel %vm124_vm1, %v122_v1, 0  ;;  %v794_v13 = vld [vmem:[%s862_s11 + $0x4] ss:$0 sps:$4 sm:$0xff]   ;;  %v795_v14 = vld [vmem:[%s862_s11] ss:$0 sps:$4 sm:$0xff]   ;;  %v190_v24 = vsel %vm188_vm4, %v123_v23, 0 }
  0x13   : > { %733 = vmatpush3.bf16.xpose.msra.mxu0 %v129_v2  ;;  %246 = vrot.lane.b32.xlu1 %v794_v13, %s829_s12  ;;  %v797_v15 = vld [vmem:[%s862_s11] ss:$0 sps:$4 sm:$0xff]   ;;  %v798_v16 = vld [vmem:[%s862_s11 + $0x4] ss:$0 sps:$4 sm:$0xff]  }
  0x14   : > { %750 = vmatprep.subr.bf16.mxu0 %v827_v0  ;;  %v799_v17 = vld [vmem:[%s862_s11] ss:$0 sps:$4 sm:$0xff]   ;;  %739 = vmatpush3.bf16.msra.mxu1 %v190_v24  ;;  %v796_v25 = vld [vmem:[%s862_s11 + $0x4] ss:$0 sps:$4 sm:$0xff]  }
  0x15   : > { %744 = vmatprep.subr.bf16.mxu1 %v827_v0 }
  0x17   : > { %241 = vrot.lane.b32.xlu1 %v795_v14, %s829_s12 }
  0x1a   : > { %735 = vmatmul.mubr.msk.bf16.vlgmr.msra.gmra.mrb[0].mxu0 %vm124_vm1, %v121_v3 }
  0x1b   : > { %752 = vmatprep.mubr.msk.bf16.mxu0 %vm828_vm0, %v827_v0  ;;  %373 = vrot.lane.b32.xlu1 %v797_v15, %s830_s13 }
  0x1f   : > { %510 = vrot.lane.b32.xlu1 %v798_v16, %s831_s14  ;;  %v802_v16 = vld [vmem:[%s862_s11 + $0x8] ss:$0 sps:$4 sm:$0xff]  }
  0x23   : > { %505 = vrot.lane.b32.xlu1 %v799_v17, %s831_s14 }
  0x85   : > { %v247_v28 = vpop.permute.xlu1 %246 }
  0x86   : > { %v252_v30 = vsel %vm124_vm1, %v247_v28, 0 }
  0x89   : > { %v242_v32 = vpop.permute.xlu1 %241 }
  0x8d   : > { %v374_v34 = vpop.permute.xlu1 %373 }
  0x91   : > { %v511_v36 = vpop.permute.xlu1 %510 }
  0x92   : > { %v516_v37 = vsel %vm124_vm1, %v511_v36, 0 }
  0x95   : > { %v506_v38 = vpop.permute.xlu1 %505 }
  0xed   : > { %v165_v7 = vpop.f32.mrb[0].mxu0 }
  0xee   : > { %v171_v8 = vsel %vm120_vm2, %v165_v7, -1e+30  ;;  %v736_v9 = vpop.f32.mrb[1].mxu0 }
  0xef   : > { %v168_v10 = vpop.f32.mrb[2].mxu0  ;;  %v173_v11 = vsel %vm172_vm3, %v171_v8, -inf  ;;  %v800_v9 = vld [vmem:[%s862_s11 + $0x8] ss:$0 sps:$4 sm:$0xff]  }
  0xf0   : > { %174 = vmax.xlane.f32.xlu0 %v173_v11  ;;  %v737_v12 = vpop.f32.mrb[3].mxu0  ;;  %v801_v10 = vld [vmem:[%s862_s11 + $0x8] ss:$0 sps:$4 sm:$0xff]  }
 0x17d   : > { %v175_v18 = vpop.xlane.xlu0 %174 }
 0x17e   : > { %v176_v19 = vsub.f32 %v171_v8, %v175_v18 }
 0x180   : > { %v177_v20 = vmul.f32 1.442695, %v176_v19 }
 0x182   : > { %803 = vpow2.f32 %v177_v20 }
 0x18c   : > { %v804_v21 = vpop.eup %803 }
 0x18d   : > { %v179_v22 = vsel %vm172_vm3, %v804_v21, 0.0 }
 0x18e   : > { %180 = vadd.xlane.f32.xlu0 %v179_v22 }
 0x1a4   : > { %378 = vrot.lane.b32.xlu0 %v796_v25, %s830_s13 }
 0x21b   : > { %v181_v26 = vpop.xlane.xlu0 %180 }
 0x21c   : > { %805 = vrcp.f32 %v181_v26 }
 0x21f   : > { %v379_v33 = vpop.permute.xlu0 %378 }
 0x220   : > { %v384_v35 = vsel %vm124_vm1, %v379_v33, 0 }
 0x226   : > { %v806_v27 = vpop.eup %805 }
 0x227   : > { %v183_v29 = vmul.f32 %v806_v27, %v804_v21 }
 0x229   : > { %v184_v31 = vpack.c.bf16 %v183_v29, %v183_v29 }
 0x22b   : > { %741 = vmatmul.mubr.msk.bf16.vlgmr.msra.gmra.mrb[0].mxu1 %vm172_vm3, %v184_v31 }
 0x22c   : > { %745 = vmatpush3.bf16.xpose.msra.mxu1 %v252_v30  ;;  %746 = vmatprep.mubr.msk.bf16.mxu1 %vm828_vm0, %v827_v0 }
 0x22d   : > { %756 = vmatprep.subr.bf16.mxu1 %v827_v0 }
 0x233   : > { %747 = vmatmul.mubr.msk.bf16.vlgmr.msra.gmra.mrb[4].mxu1 %vm124_vm1, %v242_v32 }
 0x234   : > { %757 = vmatpush3.bf16.xpose.msra.mxu1 %v384_v35  ;;  %758 = vmatprep.mubr.msk.bf16.mxu1 %vm828_vm0, %v827_v0 }
 0x235   : > { %768 = vmatprep.subr.bf16.mxu1 %v827_v0 }
 0x23b   : > { %759 = vmatmul.mubr.msk.bf16.vlgmr.msra.gmra.mrb[8].mxu1 %vm124_vm1, %v374_v34 }
 0x23c   : > { %769 = vmatpush3.bf16.xpose.msra.mxu1 %v516_v37  ;;  %770 = vmatprep.mubr.msk.bf16.mxu1 %vm828_vm0, %v827_v0 }
 0x243   : > { %771 = vmatmul.mubr.msk.bf16.vlgmr.msra.gmra.mrb[12].mxu1 %vm124_vm1, %v506_v38 }
 0x2fe   : > { %v226_v39 = vpop.f32.mrb[0].mxu1 }
 0x2ff   : > { %v232_v40 = vpack.c.bf16 %v226_v39, %v226_v39  ;;  %v742_v41 = vpop.f32.mrb[1].mxu1 }
 0x300   : > { %v229_v42 = vpop.f32.mrb[2].mxu1 }
 0x301   : > { %234 = vst.msk [vmem:[%s916_s18] sm:$0xf] %vm233_vm5, %v232_v40  ;;  %v743_v43 = vpop.f32.mrb[3].mxu1 }
 0x306   : > { %v288_v44 = vpop.f32.mrb[4].mxu1 }
 0x307   : > { %v294_v45 = vsel %vm120_vm2, %v288_v44, -1e+30  ;;  %v748_v46 = vpop.f32.mrb[5].mxu1 }
 0x308   : > { %v291_v47 = vpop.f32.mrb[6].mxu1  ;;  %v295_v48 = vsel %vm172_vm3, %v294_v45, -inf }
 0x309   : > { %296 = vmax.xlane.f32.xlu1 %v295_v48  ;;  %v749_v49 = vpop.f32.mrb[7].mxu1 }
 0x30e   : > { %v420_v50 = vpop.f32.mrb[8].mxu1 }
 0x30f   : > { %v426_v51 = vsel %vm120_vm2, %v420_v50, -1e+30  ;;  %v760_v52 = vpop.f32.mrb[9].mxu1 }
 0x310   : > { %v427_v53 = vsel %vm172_vm3, %v426_v51, -inf  ;;  %v423_v54 = vpop.f32.mrb[10].mxu1 }
 0x311   : > { %428 = vmax.xlane.f32.xlu0 %v427_v53  ;;  %v761_v55 = vpop.f32.mrb[11].mxu1 }
 0x316   : > { %v552_v56 = vpop.f32.mrb[12].mxu1 }
 0x317   : > { %v558_v57 = vsel %vm120_vm2, %v552_v56, -1e+30  ;;  %v772_v58 = vpop.f32.mrb[13].mxu1 }
 0x318   : > { %v559_v59 = vsel %vm172_vm3, %v558_v57, -inf  ;;  %v555_v60 = vpop.f32.mrb[14].mxu1 }
 0x319   : > { %560 = vmax.xlane.f32.xlu1 %v559_v59  ;;  %v773_v61 = vpop.f32.mrb[15].mxu1 }
 0x396   : > { %v297_v62 = vpop.xlane.xlu1 %296 }
 0x397   : > { %v298_v63 = vsub.f32 %v294_v45, %v297_v62 }
 0x399   : > { %v299_v1 = vmul.f32 1.442695, %v298_v63 }
 0x39b   : > { %807 = vpow2.f32 %v299_v1 }
 0x39e   : > { %v429_v2 = vpop.xlane.xlu0 %428 }
 0x39f   : > { %v430_v3 = vsub.f32 %v426_v51, %v429_v2 }
 0x3a1   : > { %v431_v4 = vmul.f32 1.442695, %v430_v3 }
 0x3a3   : > { %809 = vpow2.f32 %v431_v4 }
 0x3a5   : > { %v808_v7 = vpop.eup %807 }
 0x3a6   : > { %v301_v5 = vsel %vm172_vm3, %v808_v7, 0.0  ;;  %v561_v11 = vpop.xlane.xlu1 %560 }
 0x3a7   : > { %302 = vadd.xlane.f32.xlu1 %v301_v5  ;;  %v562_v12 = vsub.f32 %v558_v57, %v561_v11 }
 0x3a9   : > { %v563_v13 = vmul.f32 1.442695, %v562_v12 }
 0x3ab   : > { %811 = vpow2.f32 %v563_v13 }
 0x3ad   : > { %v810_v6 = vpop.eup %809 }
 0x3ae   : > { %v433_v8 = vsel %vm172_vm3, %v810_v6, 0.0 }
 0x3af   : > { %434 = vadd.xlane.f32.xlu0 %v433_v8 }
 0x3b5   : > { %v812_v14 = vpop.eup %811 }
 0x3b6   : > { %v565_v15 = vsel %vm172_vm3, %v812_v14, 0.0 }
 0x3b8   : > { %442 = vrot.lane.b32.xlu1 %v800_v9, %s830_s13 }
 0x3c5   : > { %310 = vrot.lane.b32.xlu0 %v801_v10, %s829_s12 }
 0x3dc   : > { %566 = vadd.xlane.f32.xlu1 %v565_v15 }
 0x3ed   : > { %574 = vrot.lane.b32.xlu1 %v802_v16, %s831_s14 }
 0x434   : > { %v303_v17 = vpop.xlane.xlu1 %302 }
 0x435   : > { %813 = vrcp.f32 %v303_v17 }
 0x438   : > { %v443_v23 = vpop.permute.xlu1 %442 }
 0x439   : > { %v448_v25 = vsel %vm188_vm4, %v443_v23, 0 }
 0x43c   : > { %v435_v18 = vpop.xlane.xlu0 %434 }
 0x43d   : > { %815 = vrcp.f32 %v435_v18 }
 0x43f   : > { %v814_v19 = vpop.eup %813 }
 0x440   : > { %v305_v20 = vmul.f32 %v814_v19, %v808_v7  ;;  %v311_v21 = vpop.permute.xlu0 %310 }
 0x441   : > { %v316_v22 = vsel %vm188_vm4, %v311_v21, 0 }
 0x442   : > { %751 = vmatpush3.bf16.msra.mxu0 %v316_v22  ;;  %v306_v24 = vpack.c.bf16 %v305_v20, %v305_v20 }
 0x443   : > { %762 = vmatprep.subr.bf16.mxu0 %v827_v0 }
 0x445   : > { %753 = vmatmul.mubr.msk.bf16.vlgmr.msra.gmra.mrb[4].mxu0 %vm172_vm3, %v306_v24 }
 0x446   : > { %763 = vmatpush3.bf16.msra.mxu0 %v448_v25  ;;  %764 = vmatprep.mubr.msk.bf16.mxu0 %vm828_vm0, %v827_v0 }
 0x447   : > { %v816_v26 = vpop.eup %815  ;;  %774 = vmatprep.subr.bf16.mxu0 %v827_v0 }
 0x448   : > { %v437_v27 = vmul.f32 %v816_v26, %v810_v6 }
 0x44a   : > { %v438_v28 = vpack.c.bf16 %v437_v27, %v437_v27 }
 0x44d   : > { %765 = vmatmul.mubr.msk.bf16.vlgmr.msra.gmra.mrb[8].mxu0 %vm172_vm3, %v438_v28 }
 0x44e   : > { %776 = vmatprep.mubr.msk.bf16.mxu0 %vm828_vm0, %v827_v0 }
 0x469   : > { %v567_v29 = vpop.xlane.xlu1 %566 }
 0x46a   : > { %817 = vrcp.f32 %v567_v29 }
 0x46d   : > { %v575_v30 = vpop.permute.xlu1 %574 }
 0x46e   : > { %v580_v31 = vsel %vm188_vm4, %v575_v30, 0 }
 0x46f   : > { %775 = vmatpush3.bf16.msra.mxu0 %v580_v31 }
 0x474   : > { %v818_v32 = vpop.eup %817 }
 0x475   : > { %v569_v33 = vmul.f32 %v818_v32, %v812_v14 }
 0x477   : > { %v570_v34 = vpack.c.bf16 %v569_v33, %v569_v33 }
 0x479   : > { %777 = vmatmul.mubr.msk.bf16.vlgmr.msra.gmra.mrb[12].mxu0 %vm172_vm3, %v570_v34 }
 0x518   : > { %v352_v35 = vpop.f32.mrb[4].mxu0 }
 0x519   : > { %v713_v36 = vpack.c.bf16 %v352_v35, %v352_v35  ;;  %v754_v37 = vpop.f32.mrb[5].mxu0 }
 0x51a   : > { %v355_v38 = vpop.f32.mrb[6].mxu0 }
 0x51b   : > { %362 = vrot.lane.b32.xlu0 %v713_v36, %s831_s14  ;;  %v755_v39 = vpop.f32.mrb[7].mxu0 }
 0x520   : > { %v484_v0 = vpop.f32.mrb[8].mxu0 }
 0x521   : > { %v714_v40 = vpack.c.bf16 %v484_v0, %v484_v0  ;;  %v766_v41 = vpop.f32.mrb[9].mxu0 }
 0x522   : > { %v487_v42 = vpop.f32.mrb[10].mxu0 }
 0x523   : > { %494 = vrot.lane.b32.xlu1 %v714_v40, %s830_s13  ;;  %v767_v43 = vpop.f32.mrb[11].mxu0 }
 0x54c   : > { %v616_v44 = vpop.f32.mrb[12].mxu0 }
 0x54d   : > { %v715_v45 = vpack.c.bf16 %v616_v44, %v616_v44  ;;  %v778_v46 = vpop.f32.mrb[13].mxu0 }
 0x54e   : > { %v619_v47 = vpop.f32.mrb[14].mxu0 }
 0x54f   : > { %626 = vrot.lane.b32.xlu0 %v715_v45, %s829_s12  ;;  %v779_v48 = vpop.f32.mrb[15].mxu0 }
 0x58d   : > { %v363_v49 = vpop.permute.xlu0 %362 }
 0x58e   : > { %366 = vst.msk [vmem:[%s916_s18] sm:$0xf] %vm365_vm6, %v363_v49 }
 0x595   : > { %v495_v50 = vpop.permute.xlu1 %494 }
 0x596   : > { %498 = vst.msk [vmem:[%s916_s18] sm:$0xf] %vm497_vm7, %v495_v50 }
 0x5c1   : > { %v627_v51 = vpop.permute.xlu0 %626 }
 0x5c2   : > { %630 = vst.msk [vmem:[%s916_s18] sm:$0xf] %vm629_vm8, %v627_v51 }
 0x5c3 PF: > { %s11_s6 = sadd.s32 1, %s825_s6  }
 0x5c4   : > { %p8_p4 = scmp.ge.s32.totalorder %s11_s6, 4  }
 0x5c6   :  { %10 = sbr.rel (!%p8_p4) target bundleno = 1 (0x1), region = 54 }

// kernel: transformer_forward.21
= control target key start
LH: loop header
LB: loop body
LE: loop exit
PB: predicated region body
PF: predicated region fallthrough
CT: control target
= control target key end

     0   :  { %8 = vsyncpa [#allocation4], 0  ;;  %s860_s0 = inlined_call_operand.vmem [shape: bf16[16,128], index: 0, kind: input, shape index: {}]   ;;  %s861_s1 = inlined_call_operand.hbm [shape: bf16[128,256], index: 1, kind: input, shape index: {}]   ;;  %s862_s2 = inlined_call_operand.hbm [shape: f32[1,256], index: 2, kind: input, shape index: {}]   ;;  %s863_s3 = inlined_call_operand.vmem [shape: f32[8,512], index: 3, kind: output, shape index: {}]  }
   0x1   :  { %9 = vsyncpa [#allocation6], 0  ;;  %s746_s12 = smov 0   ;;  %s748_s13 = smov 0  }
   0x2   :  { %s750_s14 = smov 0  }
   0x3 LB: > { %s531_s15 = sadd.s32 4294967295, %s719_s14   ;;  %s34_s16 = sadd.s32 1, %s715_s13  ;;  %s719_s14 = sphi %s750_s14, %s15_s14   ;;  %s715_s13 = sphi %s748_s13, %s873_s13   ;;  %s711_s12 = sphi %s746_s12, %s872_s12  }
   0x4   : > { %p36_p0 = scmp.ge.s32.totalorder %s34_s16, 2  ;;  %p533_p1 = scmp.ge.s32.totalorder %s719_s14, 1 }
   0x5   : > { %p149_p2 = scmp.lt.s32.totalorder %s719_s14, 3  ;;  %p771_p4 = scmp.eq.s32.totalorder %s531_s15, 0 }
   0x6   : > { %s875_s16 = smov (%p36_p0, %s34_s16), 0  ;;  %s721_s19 = smov [#allocation3]  }
   0x7   : > { %p767_p3 = pnand %p533_p1, %p149_p2  ;;  %s167_s20 = sshll.u32 %s721_s19, 4  ;;  %s168_s20 = int_to_ptr.vmem [resolvable:$true] %s167_s20 }
   0x8   : > { %s868_s18 = scalar_select %p771_p4, 1, 0 }
   0x9   : > { %s867_s17 = scalar_select %p767_p3, 1, 0 }
   0xa   : > { %p569_p5 = pneg %p767_p3  ;;  %s722_s22 = smov [#allocation5]  }
   0xb   : > { %s184_s23 = sshll.u32 %s722_s22, 4  ;;  %s633_s26 = scalar_lea.hbm %s861_s1, 2048  ;;  %s783_s23 = int_to_ptr.vmem [resolvable:$true] %s184_s23 }
   0xc   : > { %p779_p6 = pnand %p771_p4, %p569_p5  ;;  %p634_p7 = scmp.ne.s32.totalorder %s861_s1, %s633_s26 }
   0xd   : > { %p640_p11 = scmp.lt.u32.totalorder %s633_s26, %s861_s1 }
   0xe   : > { %p635_p8 = pneg %p779_p6 }
  0x10   : > { %p636_p9 = pnand %p635_p8, %p634_p7 }
  0x12   : > { %p637_p10 = pneg %p636_p9 }
  0x14   : > { %p642_p12 = pnand %p640_p11, %p637_p10 }
  0x16   : > { %645 = shalt.err (!%p642_p12)
}
  0x17   : > { %s646_s4 = scalar_lea.vmem %s168_s20, 2048  ;;  %p654_p2 = scmp.lt.s32.totalorder %s168_s20, %s168_s20 }
  0x18   : > { %p647_p13 = scmp.ne.s32.totalorder %s168_s20, %s646_s4  ;;  %p655_p5 = scmp.lt.s32.totalorder %s646_s4, %s646_s4 }
  0x1a   : > { %p649_p0 = pnand %p647_p13, %p635_p8  ;;  %p656_p4 = por %p655_p5, %p654_p2 }
  0x1c   : > { %p650_p1 = pneg %p649_p0 }
  0x1e   : > { %p657_p3 = pnand %p656_p4, %p650_p1 }
  0x20   : > { %660 = shalt.err (!%p657_p3)
}
  0x21   : > { %s723_s5 = smov 128   ;;  %s724_s6 = smov 8  }
  0x22   : > { %572 = dma.hbm_to_vmem [thread:$0]  (!%p779_p6), %s861_s1, 2048, %s168_s20, [#allocation4], %s723_s5, %s723_s5, %s724_s6  }
  0x23   : > { %s661_s11 = scalar_lea.hbm %s862_s2, 32 }
  0x24   : > { %p662_p7 = scmp.ne.s32.totalorder %s862_s2, %s661_s11  ;;  %p668_p9 = scmp.lt.u32.totalorder %s661_s11, %s862_s2 }
  0x26   : > { %p664_p3 = pnand %p662_p7, %p635_p8 }
  0x28   : > { %p665_p4 = pneg %p664_p3 }
  0x2a   : > { %p670_p10 = pnand %p668_p9, %p665_p4 }
  0x2c   : > { %673 = shalt.err (!%p670_p10)
}
  0x2d   : > { %s674_s20 = scalar_lea.vmem %s783_s23, 32  ;;  %p682_p0 = scmp.lt.s32.totalorder %s783_s23, %s783_s23 }
  0x2e   : > { %p675_p11 = scmp.ne.s32.totalorder %s783_s23, %s674_s20  ;;  %p683_p1 = scmp.lt.s32.totalorder %s674_s20, %s674_s20 }
  0x30   : > { %p677_p12 = pnand %p675_p11, %p635_p8  ;;  %p684_p2 = por %p683_p1, %p682_p0 }
  0x32   : > { %p678_p13 = pneg %p677_p12 }
  0x34   : > { %p685_p5 = pnand %p684_p2, %p678_p13 }
  0x36   : > { %688 = shalt.err (!%p685_p5)
}
  0x37   : > { %575 = dma.hbm_to_vmem [thread:$0]  (!%p779_p6), %s862_s2, 32, %s783_s23, [#allocation6]  }
  0x38   : > { %p870_p7 = scmp.ne.s32.totalorder %s867_s17, 0 }
  0x39   : > { %p871_p3 = scmp.ne.s32.totalorder (!%p870_p7), %s868_s18, 0 }
  0x3a   : > { %207 = sbr.rel (%p870_p7) target bundleno = 317 (0x13d), region = 32 }
  0x41   : > { %702 = dma.done.wait (%p871_p3), [#allocation4], 2048  }
  0x42   : > { %704 = vsyncadd (%p871_p3), [#allocation4], 4294965248 }
  0x43   : > { %706 = dma.done.wait (%p871_p3), [#allocation6], 32  }
  0x44   : > { %708 = vsyncadd (%p871_p3), [#allocation6], 4294967264  ;;  %v725_v0 = vmov 0   ;;  %v609_v1 = vld [vmem:[#allocation3 + $0x4] ss:$8 sps:$4 sm:$0xff]   ;;  %p238_p6 = scmp.lt.s32.totalorder %s711_s12, 1  ;;  %v414_v18 = vlaneseq }
  0x45   : > { %394 = vmatprep.mubr.bf16.mxu0 %v725_v0  ;;  %v611_v2 = vld [vmem:[#allocation3] ss:$8 sps:$4 sm:$0xff]   ;;  %362 = vmatprep.subr.bf16.mxu0 %v609_v1  ;;  %v612_v3 = vld [vmem:[#allocation3 + $0x14] ss:$8 sps:$4 sm:$0xff]   ;;  %v614_v4 = vld [vmem:[#allocation3 + $0x10] ss:$8 sps:$4 sm:$0xff]  }
  0x46   : > { %363 = vmatpush1.bf16.msra.mxu0 %v611_v2  ;;  %v615_v5 = vld [vmem:[#allocation3 + $0x24] ss:$8 sps:$4 sm:$0xff]   ;;  %v617_v6 = vld [vmem:[#allocation3 + $0x20] ss:$8 sps:$4 sm:$0xff]   ;;  %v618_v7 = vld [vmem:[#allocation3 + $0x34] ss:$8 sps:$4 sm:$0xff]  }
  0x47   : > { %364 = vmatprep.subr.bf16.mxu0 %v612_v3  ;;  %v620_v8 = vld [vmem:[#allocation3 + $0x30] ss:$8 sps:$4 sm:$0xff]   ;;  %v621_v9 = vld [vmem:[#allocation3 + $0x44] ss:$8 sps:$4 sm:$0xff]   ;;  %v623_v10 = vld [vmem:[#allocation3 + $0x40] ss:$8 sps:$4 sm:$0xff]  }
  0x48   : > { %v624_v11 = vld [vmem:[#allocation3 + $0x54] ss:$8 sps:$4 sm:$0xff]   ;;  %v626_v12 = vld [vmem:[#allocation3 + $0x50] ss:$8 sps:$4 sm:$0xff]   ;;  %v627_v13 = vld [vmem:[#allocation3 + $0x64] ss:$8 sps:$4 sm:$0xff]  }
  0x49   : > { %s239_s17 = scalar_select %p238_p6, %s711_s12, 1  ;;  %v629_v14 = vld [vmem:[#allocation3 + $0x60] ss:$8 sps:$4 sm:$0xff]   ;;  %v630_v15 = vld [vmem:[#allocation3 + $0x74] ss:$8 sps:$4 sm:$0xff]   ;;  %v415_v19 = vshrl.u32 %v414_v18, 7 }
  0x4a   : > { %365 = vmatpush1.bf16.msra.mxu0 %v614_v4  ;;  %v632_v16 = vld [vmem:[#allocation3 + $0x70] ss:$8 sps:$4 sm:$0xff]   ;;  %s541_s28 = sshll.u32 %s711_s12, 1  ;;  %v412_v21 = vld [vmem:[#allocation5] sm:$0x3] }
  0x4b   : > { %366 = vmatprep.subr.bf16.mxu0 %v615_v5  ;;  %s540_s18 = sshll.u32 %s239_s17, 2  ;;  %p250_p8 = scmp.lt.s32.totalorder %s541_s28, 3  ;;  %v416_v20 = vsub.s32 0, %v415_v19  ;;  %v420_v22 = vsub.s32 1, %v415_v19 }
  0x4c   : > { %s244_s27 = scalar_lea.vmem %s860_s0, %s540_s18 }
  0x4d   : > { %v265_v17 = vld [vmem:[%s244_s27] sm:$0xf]  ;;  %s877_s28 = smov (!%p250_p8, %s541_s28), 3  ;;  %v417_v23 = vrot.slane %v412_v21, %v416_v20  ;;  %v421_v24 = vrot.slane %v412_v21, %v420_v22 }
  0x4e   : > { %367 = vmatpush1.bf16.msra.mxu0 %v617_v6  ;;  %s542_s29 = sshll.u32 %s877_s28, 3 }
  0x4f   : > { %368 = vmatprep.subr.bf16.mxu0 %v618_v7  ;;  %s253_s5 = scalar_lea.vmem %s863_s3, %s542_s29 }
  0x52   : > { %369 = vmatpush1.bf16.msra.mxu0 %v620_v8 }
  0x53   : > { %370 = vmatprep.subr.bf16.mxu0 %v621_v9 }
  0x56   : > { %371 = vmatpush1.bf16.msra.mxu0 %v623_v10 }
  0x57   : > { %372 = vmatprep.subr.bf16.mxu0 %v624_v11 }
  0x5a   : > { %373 = vmatpush1.bf16.msra.mxu0 %v626_v12 }
  0x5b   : > { %374 = vmatprep.subr.bf16.mxu0 %v627_v13 }
  0x5e   : > { %375 = vmatpush1.bf16.msra.mxu0 %v629_v14 }
  0x5f   : > { %376 = vmatprep.subr.bf16.mxu0 %v630_v15 }
  0x62   : > { %377 = vmatpush1.bf16.msra.mxu0 %v632_v16 }
  0x65   : > { %395 = vmatmul.mubr.bf16.vlgmr.msra.gmra.mrb[0].mxu0 %v265_v17 }
 0x138   : > { %v396_v25 = vpop.f32.mrb[0].mxu0 }
 0x139   : > { %v424_v26 = vadd.f32 %v417_v23, %v396_v25  ;;  %v398_v27 = vpop.f32.mrb[1].mxu0 }
 0x13a   : > { %v425_v28 = vadd.f32 %v421_v24, %v398_v27  ;;  %v400_v29 = vpop.f32.mrb[2].mxu0 }
 0x13b   : > { %426 = vst [vmem:[%s253_s5] sm:$0xff] %v424_v26  ;;  %v401_v30 = vpop.f32.mrb[3].mxu0 }
 0x13c   : > { %427 = vst [vmem:[%s253_s5 + $0x8] sm:$0xff] %v425_v28 }
 0x13d PF: > { %s15_s14 = sadd.s32 1, %s719_s14   ;;  %s872_s12 = smov %s715_s13 }
 0x13e   : > { %p12_p4 = scmp.ge.s32.totalorder %s15_s14, 4   ;;  %s873_s13 = smov %s875_s16 }
 0x140   :  { %14 = sbr.rel (!%p12_p4) target bundleno = 3 (0x3), region = 81 }
 0x147   :  { %453 = vsyncpa [#allocation4], 1 }
 0x148   :  { %455 = vsyncpa [#allocation4 + $0x1], 1 }
 0x149   :  { %456 = vsyncpa [#allocation6], 1 }

// kernel: transformer_forward.15
= control target key start
LH: loop header
LB: loop body
LE: loop exit
PB: predicated region body
PF: predicated region fallthrough
CT: control target
= control target key end

     0   :  { %11 = vsyncpa [#allocation4], 0  ;;  %s635_s0 = inlined_call_operand.vmem [shape: bf16[16,256], index: 0, kind: input, shape index: {}]   ;;  %s636_s1 = inlined_call_operand.hbm [shape: bf16[256,128], index: 1, kind: input, shape index: {}]   ;;  %s637_s2 = inlined_call_operand.hbm [shape: f32[1,128], index: 2, kind: input, shape index: {}]   ;;  %s638_s3 = inlined_call_operand.vmem [shape: bf16[16,128], index: 3, kind: input, shape index: {}]   ;;  %s639_s4 = inlined_call_operand.hbm [shape: f32[1,128], index: 4, kind: input, shape index: {}]   ;;  %s640_s5 = inlined_call_operand.hbm [shape: f32[1,128], index: 5, kind: input, shape index: {}]   ;;  %s641_s6 = inlined_call_operand.vmem [shape: bf16[16,128], index: 6, kind: output, shape index: {}]  }
   0x1   :  { %12 = vsyncpa [#allocation6], 0 }
   0x2   :  { %13 = vsyncpa [#allocation9], 0  ;;  %s527_s21 = smov [#allocation5]   ;;  %s528_s23 = smov [#allocation3]  }
   0x3   :  { %s34_s22 = sshll.u32 %s527_s21, 4  ;;  %s21_s24 = sshll.u32 %s528_s23, 4  ;;  %s35_s22 = int_to_ptr.vmem [resolvable:$true] %s34_s22  ;;  %s568_s24 = int_to_ptr.vmem [resolvable:$true] %s21_s24 }
   0x4   :  { %s433_s27 = scalar_lea.hbm %s637_s2, 16 }
   0x5   :  { %p434_p0 = scmp.ne.s32.totalorder %s637_s2, %s433_s27  ;;  %p437_p1 = scmp.lt.u32.totalorder %s433_s27, %s637_s2 }
   0x7   :  { %p439_p2 = pnand %p437_p1, %p434_p0 }
   0x9   :  { %442 = shalt.err (!%p439_p2)
}
   0xa   :  { %s443_s8 = scalar_lea.vmem %s35_s22, 16  ;;  %s447_s9 = scalar_lea.vmem %s35_s22, 32 }
   0xb   :  { %p444_p3 = scmp.ne.s32.totalorder %s35_s22, %s443_s8  ;;  %p448_p4 = scmp.lt.s32.totalorder %s35_s22, %s35_s22 }
   0xc   :  { %p449_p5 = scmp.lt.s32.totalorder %s447_s9, %s443_s8 }
   0xe   :  { %p450_p6 = por %p449_p5, %p448_p4 }
  0x10   :  { %p451_p7 = pnand %p450_p6, %p444_p3 }
  0x12   :  { %454 = shalt.err (!%p451_p7)
}
  0x13   :  { %37 = dma.hbm_to_vmem [thread:$0]  %s637_s2, 16, %s35_s22, [#allocation6]  }
  0x14   :  { %s455_s14 = scalar_lea.hbm %s636_s1, 2048 }
  0x15   :  { %p456_p8 = scmp.ne.s32.totalorder %s636_s1, %s455_s14  ;;  %p459_p9 = scmp.lt.u32.totalorder %s455_s14, %s636_s1 }
  0x17   :  { %p461_p10 = pnand %p459_p9, %p456_p8 }
  0x19   :  { %464 = shalt.err (!%p461_p10)
}
  0x1a   :  { %s465_s19 = scalar_lea.vmem %s568_s24, 2048  ;;  %p470_p12 = scmp.lt.s32.totalorder %s568_s24, %s568_s24 }
  0x1b   :  { %p466_p11 = scmp.ne.s32.totalorder %s568_s24, %s465_s19  ;;  %p471_p13 = scmp.lt.s32.totalorder %s465_s19, %s465_s19 }
  0x1d   :  { %p472_p0 = por %p471_p13, %p470_p12 }
  0x1f   :  { %p473_p1 = pnand %p472_p0, %p466_p11 }
  0x21   :  { %476 = shalt.err (!%p473_p1)
}
  0x22   :  { %s529_s2 = smov 64   ;;  %s530_s20 = smov 4  }
  0x23   :  { %27 = dma.hbm_to_vmem [thread:$0]  %s636_s1, 2048, %s568_s24, [#allocation4], %s529_s2, %s529_s2, %s530_s20  }
  0x24   :  { %s531_s23 = smov [#allocation7]   ;;  %s532_s26 = smov [#allocation8]  }
  0x25   :  { %s46_s25 = sshll.u32 %s531_s23, 4  ;;  %s56_s27 = sshll.u32 %s532_s26, 4  ;;  %s47_s25 = int_to_ptr.vmem [resolvable:$true] %s46_s25  ;;  %s57_s27 = int_to_ptr.vmem [resolvable:$true] %s56_s27 }
  0x26   :  { %s477_s30 = scalar_lea.hbm %s639_s4, 16 }
  0x27   :  { %p478_p2 = scmp.ne.s32.totalorder %s639_s4, %s477_s30  ;;  %p481_p3 = scmp.lt.u32.totalorder %s477_s30, %s639_s4 }
  0x29   :  { %p483_p4 = pnand %p481_p3, %p478_p2 }
  0x2b   :  { %486 = shalt.err (!%p483_p4)
}
  0x2c   :  { %s487_s1 = scalar_lea.vmem %s47_s25, 16  ;;  %s491_s24 = scalar_lea.vmem %s47_s25, 32 }
  0x2d   :  { %p488_p5 = scmp.ne.s32.totalorder %s47_s25, %s487_s1  ;;  %p492_p6 = scmp.lt.s32.totalorder %s47_s25, %s47_s25 }
  0x2e   :  { %p493_p7 = scmp.lt.s32.totalorder %s491_s24, %s487_s1 }
  0x30   :  { %p494_p8 = por %p493_p7, %p492_p6 }
  0x32   :  { %p495_p9 = pnand %p494_p8, %p488_p5 }
  0x34   :  { %498 = shalt.err (!%p495_p9)
}
  0x35   :  { %49 = dma.hbm_to_vmem [thread:$0]  %s639_s4, 16, %s47_s25, [#allocation6]  }
  0x36   :  { %s499_s15 = scalar_lea.hbm %s640_s5, 16 }
  0x37   :  { %p500_p10 = scmp.ne.s32.totalorder %s640_s5, %s499_s15  ;;  %p503_p11 = scmp.lt.u32.totalorder %s499_s15, %s640_s5 }
  0x39   :  { %p505_p12 = pnand %p503_p11, %p500_p10 }
  0x3b   :  { %508 = shalt.err (!%p505_p12)
}
  0x3c   :  { %s509_s2 = scalar_lea.vmem %s57_s27, 16  ;;  %s513_s20 = scalar_lea.vmem %s57_s27, 32 }
  0x3d   :  { %p510_p13 = scmp.ne.s32.totalorder %s57_s27, %s509_s2  ;;  %p514_p0 = scmp.lt.s32.totalorder %s57_s27, %s57_s27 }
  0x3e   :  { %p515_p1 = scmp.lt.s32.totalorder %s513_s20, %s509_s2 }
  0x40   :  { %p516_p2 = por %p515_p1, %p514_p0 }
  0x42   :  { %p517_p3 = pnand %p516_p2, %p510_p13 }
  0x44   :  { %520 = shalt.err (!%p517_p3)
}
  0x45   :  { %59 = dma.hbm_to_vmem [thread:$0]  %s640_s5, 16, %s57_s27, [#allocation9]  }
  0x46   :  { %521 = dma.done.wait [#allocation4], 2048  }
  0x47   :  { %522 = vsyncadd [#allocation4], 4294965248 }
  0x48   :  { %523 = dma.done.wait [#allocation6], 32  }
  0x49   :  { %524 = vsyncadd [#allocation6], 4294967264 }
  0x4a   :  { %525 = dma.done.wait [#allocation9], 16  }
  0x4b   :  { %526 = vsyncadd [#allocation9], 4294967280  ;;  %v410_v0 = vld [vmem:[#allocation3 + $0x40] sm:$0xff]   ;;  %v412_v2 = vld [vmem:[#allocation3 + $0x48] sm:$0xff]  }
  0x4c   :  { %v411_v1 = vld [vmem:[#allocation3] sm:$0xff]   ;;  %382 = vmatprep.subr.bf16.mxu0 %v410_v0  ;;  %v413_v3 = vld [vmem:[#allocation3 + $0x8] sm:$0xff]   ;;  %v414_v4 = vld [vmem:[#allocation3 + $0x50] sm:$0xff]  }
  0x4d   :  { %383 = vmatpush3.bf16.msra.mxu0 %v411_v1  ;;  %v415_v5 = vld [vmem:[#allocation3 + $0x10] sm:$0xff]   ;;  %v416_v6 = vld [vmem:[#allocation3 + $0x58] sm:$0xff]   ;;  %v418_v8 = vld [vmem:[#allocation3 + $0x60] sm:$0xff]  }
  0x4e   :  { %384 = vmatprep.subr.bf16.mxu0 %v412_v2  ;;  %v417_v7 = vld [vmem:[#allocation3 + $0x18] sm:$0xff]   ;;  %v419_v9 = vld [vmem:[#allocation3 + $0x20] sm:$0xff]   ;;  %v420_v10 = vld [vmem:[#allocation3 + $0x68] sm:$0xff]  }
  0x4f   :  { %v428_v11 = vld [vmem:[%s635_s0 + $0x4] ss:$8 sps:$4 sm:$0xff]   ;;  %v422_v13 = vld [vmem:[#allocation3 + $0x70] sm:$0xff]   ;;  %v424_v15 = vld [vmem:[#allocation3 + $0x78] sm:$0xff]  }
  0x50   :  { %v421_v12 = vld [vmem:[#allocation3 + $0x28] sm:$0xff]   ;;  %253 = vmatprep.mubr.bf16.mxu0 %v428_v11  ;;  %v423_v14 = vld [vmem:[#allocation3 + $0x30] sm:$0xff]   ;;  %v425_v16 = vld [vmem:[#allocation3 + $0x38] sm:$0xff]  }
  0x51   :  { %385 = vmatpush3.bf16.msra.mxu0 %v413_v3  ;;  %v426_v17 = vld [vmem:[%s635_s0] ss:$8 sps:$4 sm:$0xff]   ;;  %v368_v56 = vld [vmem:[#allocation8] ss:$0 sm:$0xff] }
  0x52   :  { %386 = vmatprep.subr.bf16.mxu0 %v414_v4  ;;  %v374_v18 = vld [vmem:[%s638_s3] sm:$0xff]  }
  0x53   :  { %v366_v21 = vld [vmem:[#allocation5] ss:$0 sm:$0xff]  ;;  %v375_v24 = vunpack.c.l.bf16 %v374_v18  ;;  %v376_v28 = vunpack.c.h.bf16 %v374_v18  ;;  %v367_v51 = vld [vmem:[#allocation7] ss:$0 sm:$0xff] }
  0x55   :  { %387 = vmatpush3.bf16.msra.mxu0 %v415_v5 }
  0x56   :  { %388 = vmatprep.subr.bf16.mxu0 %v416_v6 }
  0x59   :  { %389 = vmatpush3.bf16.msra.mxu0 %v417_v7 }
  0x5a   :  { %390 = vmatprep.subr.bf16.mxu0 %v418_v8 }
  0x5d   :  { %391 = vmatpush3.bf16.msra.mxu0 %v419_v9 }
  0x5e   :  { %392 = vmatprep.subr.bf16.mxu0 %v420_v10 }
  0x61   :  { %393 = vmatpush3.bf16.msra.mxu0 %v421_v12 }
  0x62   :  { %394 = vmatprep.subr.bf16.mxu0 %v422_v13 }
  0x65   :  { %395 = vmatpush3.bf16.msra.mxu0 %v423_v14 }
  0x66   :  { %396 = vmatprep.subr.bf16.mxu0 %v424_v15 }
  0x69   :  { %397 = vmatpush3.bf16.msra.mxu0 %v425_v16 }
  0x6c   :  { %254 = vmatmul.mubr.bf16.vlgmr.msra.gmra.mrb[0].mxu0 %v426_v17 }
 0x13f   :  { %v398_v19 = vpop.f32.mrb[0].mxu0 }
 0x140   :  { %v399_v20 = vpop.f32.mrb[1].mxu0 }
 0x141   :  { %v400_v22 = vadd.f32 %v399_v20, %v398_v19  ;;  %v401_v23 = vpop.f32.mrb[2].mxu0 }
 0x142   :  { %v402_v25 = vpop.f32.mrb[3].mxu0 }
 0x143   :  { %v278_v26 = vadd.f32 %v400_v22, %v366_v21  ;;  %v403_v27 = vadd.f32 %v402_v25, %v401_v23 }
 0x145   :  { %v279_v29 = vadd.f32 %v403_v27, %v366_v21  ;;  %v284_v30 = vadd.f32 %v375_v24, %v278_v26 }
 0x147   :  { %286 = vadd.xlane.f32.xlu0 %v284_v30  ;;  %v293_v31 = vmul.f32 %v284_v30, %v284_v30  ;;  %v285_v32 = vadd.f32 %v376_v28, %v279_v29 }
 0x149   :  { %295 = vadd.xlane.f32.xlu1 %v293_v31  ;;  %v294_v33 = vmul.f32 %v285_v32, %v285_v32 }
 0x14b   :  { %288 = vadd.xlane.f32.xlu0 %v285_v32 }
 0x14d   :  { %297 = vadd.xlane.f32.xlu1 %v294_v33 }
 0x1d4   :  { %v287_v34 = vpop.xlane.xlu0 %286 }
 0x1d5   :  { %v291_v35 = vmul.f32 0.0078125, %v287_v34 }
 0x1d6   :  { %v296_v36 = vpop.xlane.xlu1 %295 }
 0x1d7   :  { %v301_v37 = vmul.f32 %v291_v35, %v291_v35  ;;  %v299_v38 = vmul.f32 0.0078125, %v296_v36  ;;  %v305_v48 = vsub.f32 %v284_v30, %v291_v35 }
 0x1d8   :  { %v289_v39 = vpop.xlane.xlu0 %288 }
 0x1d9   :  { %v303_v40 = vsub.f32 %v299_v38, %v301_v37  ;;  %v292_v41 = vmul.f32 0.0078125, %v289_v39 }
 0x1da   :  { %v298_v42 = vpop.xlane.xlu1 %297 }
 0x1db   :  { %v307_v43 = vadd.f32 1e-05, %v303_v40  ;;  %v302_v44 = vmul.f32 %v292_v41, %v292_v41  ;;  %v300_v45 = vmul.f32 0.0078125, %v298_v42  ;;  %v306_v52 = vsub.f32 %v285_v32, %v292_v41 }
 0x1dd   :  { %429 = vrsqrt.f32 %v307_v43  ;;  %v304_v46 = vsub.f32 %v300_v45, %v302_v44 }
 0x1df   :  { %v308_v47 = vadd.f32 1e-05, %v304_v46 }
 0x1e1   :  { %431 = vrsqrt.f32 %v308_v47 }
 0x1e7   :  { %v430_v49 = vpop.eup %429 }
 0x1e8   :  { %v311_v50 = vmul.f32 %v430_v49, %v305_v48 }
 0x1ea   :  { %v320_v54 = vmul.f32 %v367_v51, %v311_v50 }
 0x1eb   :  { %v432_v53 = vpop.eup %431 }
 0x1ec   :  { %v312_v55 = vmul.f32 %v432_v53, %v306_v52  ;;  %v329_v58 = vadd.f32 %v368_v56, %v320_v54 }
 0x1ee   :  { %v321_v57 = vmul.f32 %v367_v51, %v312_v55 }
 0x1f0   :  { %v330_v59 = vadd.f32 %v368_v56, %v321_v57 }
 0x1f2   :  { %v380_v60 = vpack.c.bf16 %v330_v59, %v329_v58 }
 0x1f4   :  { %381 = vst [vmem:[%s641_s6] sm:$0xff] %v380_v60  }
 0x1f5   :  { %345 = vsyncpa [#allocation4], 1 }
 0x1f6   :  { %346 = vsyncpa [#allocation6], 1 }
 0x1f7   :  { %347 = vsyncpa [#allocation9], 1 }

</bundles_post_ra>
